<compile_context>
chip_gen: v7x
topology: tpu7x:2x2x1
jax: 0.10.0
libtpu: 0.0.40
codegen_flags: <defaults>
</compile_context>

<pallas_src>
import functools

import jax
import jax.numpy as jnp
import numpy as np
from jax.experimental import pallas as pl
from jax.experimental.pallas import tpu as pltpu


# ----------------------------------------------------------------------------
# Fused kernel: whole MotionModel forward, all batch elements at once.
# ----------------------------------------------------------------------------
def _motion_kernel(
    x_ref,                 # (Cin, S1)        input, spatial-on-lanes (S1 = N*H*W)
    w1_ref, b1_ref,        # (9, C1, Cin), (C1, 1)   per-tap weights (BN scale folded), bias
    w2_ref, b2_ref,        # (9, C1, C1),  (C1, 1)
    cs_ref,                # (1, S1)          ones@mask1 multiplier (col-sums of mask1)
    bm1_ref,               # (9, S1)          0/1 boundary masks, stage-1 geometry
    p1_ref,                # (S1, S2)         2x2 avg-pool matrix (transposed), S2 = N*Hp*Wp
    w3_ref, b3_ref,        # (9, C2, C1), (C2, 1)
    w4_ref, b4_ref,        # (9, C2, C2), (C2, 1)
    mask2_ref,             # (C2, S2)         module's mask2, spatial-on-lanes
    bm2_ref,               # (9, S2)          boundary masks, stage-2 geometry
    p2_ref,                # (S2, S3)         pool matrix stage 2, S3 = N*Hq*Wq
    o_ref,                 # (C2, S3)         output
    *, W,
):
    Wp = W // 2

    def conv3x3(act, w_ref, b_ref, bm_ref, row_w):
        """3x3 conv (stride 1, pad 1) + folded BN on a (Cin, S) slab."""
        S = act.shape[-1]
        # Center tap: no shift, no boundary mask needed.
        acc = jnp.dot(w_ref[4], act, preferred_element_type=jnp.float32)
        for t in range(9):
            if t == 4:
                continue
            dy, dx = t // 3 - 1, t % 3 - 1
            off = dy * row_w + dx                      # neighbor offset in flat spatial index
            shifted = pltpu.roll(act, shift=(-off) % S, axis=1)   # XLU lane rotation
            shifted = shifted * bm_ref[t:t + 1, :]     # zero taps that fall outside the image
            acc = acc + jnp.dot(w_ref[t], shifted, preferred_element_type=jnp.float32)
        return acc + b_ref[...]                        # folded conv-bias + BN bias (per channel)

    x = x_ref[...].astype(jnp.float32)                                   # (Cin, S1)

    # --- stage 1: conv1+BN+tanh -> conv2+BN -> (ones@mask1)*, tanh -> avgpool
    a1 = jnp.tanh(conv3x3(x, w1_ref, b1_ref, bm1_ref, W))                # (C1, S1)
    a2 = conv3x3(a1, w2_ref, b2_ref, bm1_ref, W)                         # (C1, S1)
    g1 = jnp.tanh(a2 * cs_ref[...])                                      # sublane-broadcast row
    # Dropout2d(p=0.5): identity under eval-mode semantics.
    h1 = jnp.dot(g1, p1_ref[...], preferred_element_type=jnp.float32)    # (C1, S2)

    # --- stage 2: conv3+BN+tanh -> conv4+BN -> mask2*, tanh -> avgpool -> tanh
    a3 = jnp.tanh(conv3x3(h1, w3_ref, b3_ref, bm2_ref, Wp))              # (C2, S2)
    a4 = conv3x3(a3, w4_ref, b4_ref, bm2_ref, Wp)                        # (C2, S2)
    g2 = jnp.tanh(a4 * mask2_ref[...])
    # Dropout2d(p=0.5): identity under eval-mode semantics.
    h2 = jnp.dot(g2, p2_ref[...], preferred_element_type=jnp.float32)    # (C2, S3)
    o_ref[...] = jnp.tanh(h2).astype(o_ref.dtype)


# ----------------------------------------------------------------------------
# Host-side helpers (run at trace time; all become constants / small inputs)
# ----------------------------------------------------------------------------
def _pool_matrix_T(n, h, w):
    """(n*h*w, n*(h//2)*(w//2)) matrix: act(C,S) @ M == 2x2/stride-2 avg pool."""
    hp, wp = h // 2, w // 2
    m = np.zeros((n * h * w, n * hp * wp), np.float32)
    for b in range(n):
        for ph in range(hp):
            for pw in range(wp):
                c = (b * hp + ph) * wp + pw
                for dy in range(2):
                    for dx in range(2):
                        r = (b * h + 2 * ph + dy) * w + 2 * pw + dx
                        m[r, c] = 0.25
    return jnp.asarray(m)


def _tap_masks(n, h, w):
    """(9, n*h*w) 0/1 masks: tap (dy,dx) is valid iff neighbor is inside the image.

    Batch elements occupy contiguous row-aligned blocks of the flattened axis,
    so the top/bottom masks also prevent cross-batch-element reads."""
    s = n * h * w
    ys = (np.arange(s) // w) % h
    xs = np.arange(s) % w
    m = np.ones((9, s), np.float32)
    for t in range(9):
        dy, dx = t // 3 - 1, t % 3 - 1
        ok = (ys + dy >= 0) & (ys + dy <= h - 1) & (xs + dx >= 0) & (xs + dx <= w - 1)
        m[t] = ok.astype(np.float32)
    return jnp.asarray(m)


def _fold_weights(p_conv, p_bn, eps=1e-5):
    """HWIO conv weights -> (9, Cout, Cin) per-tap matrices with BN scale folded;
    returns folded per-channel bias as a (Cout, 1) column."""
    w = p_conv["w"]                                             # (3, 3, Ci, Co)
    ci, co = w.shape[2], w.shape[3]
    scale = p_bn["gamma"] / jnp.sqrt(p_bn["var"] + eps)         # (Co,)
    bias = p_bn["beta"] + scale * (p_conv["b"] - p_bn["mean"])  # (Co,)
    wt = jnp.transpose(w, (0, 1, 3, 2)).reshape(9, co, ci)      # tap-major, (Co, Ci)
    wt = wt * scale[None, :, None]
    return wt.astype(jnp.float32), bias.reshape(co, 1).astype(jnp.float32)


def motion_model_forward(params, inputs_nchw, mask1, mask2_nchw):
    N, Cin, H, W = inputs_nchw.shape
    C1 = params["conv1"]["w"].shape[-1]
    C2 = params["conv3"]["w"].shape[-1]
    Hp, Wp = H // 2, W // 2
    Hq, Wq = H // 4, W // 4
    S1, S2, S3 = N * H * W, N * Hp * Wp, N * Hq * Wq

    # Spatial-on-lanes: (C, N*H*W) with flat index s = (n*H + y)*W + x.
    x_cs = jnp.transpose(inputs_nchw, (1, 0, 2, 3)).reshape(Cin, S1).astype(jnp.float32)

    w1, b1 = _fold_weights(params["conv1"], params["bn1"])
    w2, b2 = _fold_weights(params["conv2"], params["bn2"])
    w3, b3 = _fold_weights(params["conv3"], params["bn3"])
    w4, b4 = _fold_weights(params["conv4"], params["bn4"])

    # ones @ mask1: every element equals the column-sum of mask1 at its W index.
    colsum = jnp.sum(mask1, axis=0)                                       # (W,)
    cs = jnp.tile(colsum, N * H).reshape(1, S1).astype(jnp.float32)       # lane-major row

    bm1 = _tap_masks(N, H, W)            # (9, S1)
    bm2 = _tap_masks(N, Hp, Wp)          # (9, S2)
    p1 = _pool_matrix_T(N, H, W)         # (S1, S2)
    p2 = _pool_matrix_T(N, Hp, Wp)       # (S2, S3)

    m2f = jnp.transpose(mask2_nchw, (1, 0, 2, 3)).reshape(C2, S2).astype(jnp.float32)

    kern = functools.partial(_motion_kernel, W=W)
    out = pl.pallas_call(
        kern,
        out_shape=jax.ShapeDtypeStruct((C2, S3), jnp.float32),
        grid=(1,),
        in_specs=[
            pl.BlockSpec((Cin, S1), lambda i: (0, 0)),
            pl.BlockSpec((9, C1, Cin), lambda i: (0, 0, 0)),
            pl.BlockSpec((C1, 1), lambda i: (0, 0)),
            pl.BlockSpec((9, C1, C1), lambda i: (0, 0, 0)),
            pl.BlockSpec((C1, 1), lambda i: (0, 0)),
            pl.BlockSpec((1, S1), lambda i: (0, 0)),
            pl.BlockSpec((9, S1), lambda i: (0, 0)),
            pl.BlockSpec((S1, S2), lambda i: (0, 0)),
            pl.BlockSpec((9, C2, C1), lambda i: (0, 0, 0)),
            pl.BlockSpec((C2, 1), lambda i: (0, 0)),
            pl.BlockSpec((9, C2, C2), lambda i: (0, 0, 0)),
            pl.BlockSpec((C2, 1), lambda i: (0, 0)),
            pl.BlockSpec((C2, S2), lambda i: (0, 0)),
            pl.BlockSpec((9, S2), lambda i: (0, 0)),
            pl.BlockSpec((S2, S3), lambda i: (0, 0)),
        ],
        out_specs=pl.BlockSpec((C2, S3), lambda i: (0, 0)),
        compiler_params=pltpu.CompilerParams(
            dimension_semantics=("arbitrary",)),
    )(x_cs, w1, b1, w2, b2, cs, bm1, p1, w3, b3, w4, b4, m2f, bm2, p2)

    # (C2, N*Hq*Wq) -> (N, C2, Hq, Wq)
    return jnp.transpose(out.reshape(C2, N, Hq, Wq), (1, 0, 2, 3))


# ----------------------------------------------------------------------------
# Parameters (deterministic synthetic init)
# ----------------------------------------------------------------------------
def init_params(key, cin, cout):
    ks = jax.random.split(key, 8)

    def conv_p(k, ci, co):
        kw, kb = jax.random.split(k)
        w = jax.random.normal(kw, (3, 3, ci, co), jnp.float32) / jnp.sqrt(9.0 * ci)
        b = jax.random.normal(kb, (co,), jnp.float32) * 0.05
        return {"w": w, "b": b}

    def bn_p(k, co):
        k1, k2, k3, k4 = jax.random.split(k, 4)
        return {
            "gamma": jax.random.uniform(k1, (co,), jnp.float32, 0.5, 1.5),
            "beta": jax.random.normal(k2, (co,), jnp.float32) * 0.1,
            "mean": jax.random.normal(k3, (co,), jnp.float32) * 0.1,
            "var": jax.random.uniform(k4, (co,), jnp.float32, 0.5, 1.5),
        }

    return {
        "conv1": conv_p(ks[0], cin, cout),          "bn1": bn_p(ks[1], cout),
        "conv2": conv_p(ks[2], cout, cout),         "bn2": bn_p(ks[3], cout),
        "conv3": conv_p(ks[4], cout, 2 * cout),     "bn3": bn_p(ks[5], 2 * cout),
        "conv4": conv_p(ks[6], 2 * cout, 2 * cout), "bn4": bn_p(ks[7], 2 * cout),
    }


# ----------------------------------------------------------------------------
# Pure-JAX reference (for correctness check)
# ----------------------------------------------------------------------------
def _avgpool2_ref(x):
    N, H, W, C = x.shape
    return x.reshape(N, H // 2, 2, W // 2, 2, C).mean(axis=(2, 4))


def reference_forward(params, inputs_nchw, mask1, mask2_nchw):
    dn = ("NHWC", "HWIO", "NHWC")

    def conv_bn_ref(x, p_conv, p_bn, act):
        y = jax.lax.conv_general_dilated(
            x, p_conv["w"], (1, 1), [(1, 1), (1, 1)], dimension_numbers=dn
        ) + p_conv["b"][None, None, None, :]
        scale = p_bn["gamma"] / jnp.sqrt(p_bn["var"] + 1e-5)
        y = scale * (y - p_bn["mean"]) + p_bn["beta"]
        return jnp.tanh(y) if act else y

    x = jnp.transpose(inputs_nchw, (0, 2, 3, 1))
    M1 = conv_bn_ref(x, params["conv1"], params["bn1"], True)
    M2 = conv_bn_ref(M1, params["conv2"], params["bn2"], False)
    cs = jnp.sum(mask1, axis=0)
    g1 = jnp.tanh(cs[None, None, :, None] * M2)
    M4 = _avgpool2_ref(g1)
    M5 = conv_bn_ref(M4, params["conv3"], params["bn3"], True)
    M6 = conv_bn_ref(M5, params["conv4"], params["bn4"], False)
    g2 = jnp.tanh(jnp.transpose(mask2_nchw, (0, 2, 3, 1)) * M6)
    out = jnp.tanh(_avgpool2_ref(g2))
    return jnp.transpose(out, (0, 3, 1, 2))


if __name__ == "__main__":
    key = jax.random.PRNGKey(0)
    N, Cin, H, W = 2, 4, 16, 16
    Cout = 8  # out_channels; conv3/conv4 use 2*Cout = 16

    k_in, k_m1, k_m2, k_p = jax.random.split(key, 4)
    inputs = jax.random.normal(k_in, (N, Cin, H, W), jnp.float32)                # NCHW
    mask1 = jax.random.normal(k_m1, (W, W), jnp.float32) * 0.2                   # (W, W)
    mask2 = jax.random.normal(k_m2, (N, 2 * Cout, H // 2, W // 2), jnp.float32)  # NCHW

    params = init_params(k_p, Cin, Cout)

    fwd = jax.jit(motion_model_forward)
    out = jax.block_until_ready(fwd(params, inputs, mask1, mask2))
    ref = jax.block_until_ready(reference_forward(params, inputs, mask1, mask2))

    assert out.shape == (N, 2 * Cout, H // 4, W // 4), out.shape
    np.testing.assert_allclose(np.asarray(out), np.asarray(ref), atol=5e-4, rtol=5e-4)
    print("KERNEL_OK")
</pallas_src>

<mosaic_0001>
module attributes {stable_mosaic.version = 11 : i64} {
  func.func @_motion_kernel(%arg0: i32, %arg1: memref<4x512xf32, #tpu.memory_space<vmem>>, %arg2: memref<9x8x4xf32, #tpu.memory_space<vmem>>, %arg3: memref<8x1xf32, #tpu.memory_space<vmem>>, %arg4: memref<9x8x8xf32, #tpu.memory_space<vmem>>, %arg5: memref<8x1xf32, #tpu.memory_space<vmem>>, %arg6: memref<1x512xf32, #tpu.memory_space<vmem>>, %arg7: memref<9x512xf32, #tpu.memory_space<vmem>>, %arg8: memref<512x128xf32, #tpu.memory_space<vmem>>, %arg9: memref<9x16x8xf32, #tpu.memory_space<vmem>>, %arg10: memref<16x1xf32, #tpu.memory_space<vmem>>, %arg11: memref<9x16x16xf32, #tpu.memory_space<vmem>>, %arg12: memref<16x1xf32, #tpu.memory_space<vmem>>, %arg13: memref<16x128xf32, #tpu.memory_space<vmem>>, %arg14: memref<9x128xf32, #tpu.memory_space<vmem>>, %arg15: memref<128x32xf32, #tpu.memory_space<vmem>>, %arg16: memref<16x32xf32, #tpu.memory_space<vmem>>) attributes {dimension_semantics = [#tpu.dimension_semantics<arbitrary>], iteration_bounds = array<i64: 1>, scalar_prefetch = 0 : i64, scratch_operands = 0 : i64, tpu.core_type = #tpu.core_type<tc>, window_params = [{pipeline_mode = #tpu.pipeline_mode<synchronous>, transform_indices = @transform_0, window_bounds = array<i64: 4, 512>}, {pipeline_mode = #tpu.pipeline_mode<synchronous>, transform_indices = @transform_1, window_bounds = array<i64: 9, 8, 4>}, {pipeline_mode = #tpu.pipeline_mode<synchronous>, transform_indices = @transform_2, window_bounds = array<i64: 8, 1>}, {pipeline_mode = #tpu.pipeline_mode<synchronous>, transform_indices = @transform_3, window_bounds = array<i64: 9, 8, 8>}, {pipeline_mode = #tpu.pipeline_mode<synchronous>, transform_indices = @transform_4, window_bounds = array<i64: 8, 1>}, {pipeline_mode = #tpu.pipeline_mode<synchronous>, transform_indices = @transform_5, window_bounds = array<i64: 1, 512>}, {pipeline_mode = #tpu.pipeline_mode<synchronous>, transform_indices = @transform_6, window_bounds = array<i64: 9, 512>}, {pipeline_mode = #tpu.pipeline_mode<synchronous>, transform_indices = @transform_7, window_bounds = array<i64: 512, 128>}, {pipeline_mode = #tpu.pipeline_mode<synchronous>, transform_indices = @transform_8, window_bounds = array<i64: 9, 16, 8>}, {pipeline_mode = #tpu.pipeline_mode<synchronous>, transform_indices = @transform_9, window_bounds = array<i64: 16, 1>}, {pipeline_mode = #tpu.pipeline_mode<synchronous>, transform_indices = @transform_10, window_bounds = array<i64: 9, 16, 16>}, {pipeline_mode = #tpu.pipeline_mode<synchronous>, transform_indices = @transform_11, window_bounds = array<i64: 16, 1>}, {pipeline_mode = #tpu.pipeline_mode<synchronous>, transform_indices = @transform_12, window_bounds = array<i64: 16, 128>}, {pipeline_mode = #tpu.pipeline_mode<synchronous>, transform_indices = @transform_13, window_bounds = array<i64: 9, 128>}, {pipeline_mode = #tpu.pipeline_mode<synchronous>, transform_indices = @transform_14, window_bounds = array<i64: 128, 32>}, {pipeline_mode = #tpu.pipeline_mode<synchronous>, transform_indices = @transform_15, window_bounds = array<i64: 16, 32>}]} {
    %c0 = arith.constant 0 : index
    %c0_0 = arith.constant 0 : index
    %0 = vector.load %arg1[%c0, %c0_0] : memref<4x512xf32, #tpu.memory_space<vmem>>, vector<4x512xf32>
    %c4 = arith.constant 4 : index
    %c0_1 = arith.constant 0 : index
    %c0_2 = arith.constant 0 : index
    %1 = vector.load %arg2[%c4, %c0_1, %c0_2] : memref<9x8x4xf32, #tpu.memory_space<vmem>>, vector<1x8x4xf32>
    %2 = vector.shape_cast %1 : vector<1x8x4xf32> to vector<8x4xf32>
    %cst = arith.constant dense<0.000000e+00> : vector<8x512xf32>
    %3 = tpu.matmul %2, %0, %cst {dimension_numbers = #tpu.dot_dimension_numbers<[1], [0], [0], [1], [0, 0, 1, 1], [], []>} : vector<8x4xf32>, vector<4x512xf32>, vector<8x512xf32> -> vector<8x512xf32>
    %c17_i32 = arith.constant 17 : i32
    %4 = tpu.dynamic_rotate %0 by %c17_i32 dim 1 : vector<4x512xf32>, i32 -> vector<4x512xf32>
    %c0_3 = arith.constant 0 : index
    %c0_4 = arith.constant 0 : index
    %5 = vector.load %arg7[%c0_3, %c0_4] : memref<9x512xf32, #tpu.memory_space<vmem>>, vector<1x512xf32>
    %6 = vector.broadcast %5 : vector<1x512xf32> to vector<4x512xf32>
    %7 = arith.mulf %4, %6 : vector<4x512xf32>
    %c0_5 = arith.constant 0 : index
    %c0_6 = arith.constant 0 : index
    %c0_7 = arith.constant 0 : index
    %8 = vector.load %arg2[%c0_5, %c0_6, %c0_7] : memref<9x8x4xf32, #tpu.memory_space<vmem>>, vector<1x8x4xf32>
    %9 = vector.shape_cast %8 : vector<1x8x4xf32> to vector<8x4xf32>
    %cst_8 = arith.constant dense<0.000000e+00> : vector<8x512xf32>
    %10 = tpu.matmul %9, %7, %cst_8 {dimension_numbers = #tpu.dot_dimension_numbers<[1], [0], [0], [1], [0, 0, 1, 1], [], []>} : vector<8x4xf32>, vector<4x512xf32>, vector<8x512xf32> -> vector<8x512xf32>
    %11 = arith.addf %3, %10 : vector<8x512xf32>
    %c16_i32 = arith.constant 16 : i32
    %12 = tpu.dynamic_rotate %0 by %c16_i32 dim 1 : vector<4x512xf32>, i32 -> vector<4x512xf32>
    %c1 = arith.constant 1 : index
    %c0_9 = arith.constant 0 : index
    %13 = vector.load %arg7[%c1, %c0_9] : memref<9x512xf32, #tpu.memory_space<vmem>>, vector<1x512xf32>
    %14 = vector.broadcast %13 : vector<1x512xf32> to vector<4x512xf32>
    %15 = arith.mulf %12, %14 : vector<4x512xf32>
    %c1_10 = arith.constant 1 : index
    %c0_11 = arith.constant 0 : index
    %c0_12 = arith.constant 0 : index
    %16 = vector.load %arg2[%c1_10, %c0_11, %c0_12] : memref<9x8x4xf32, #tpu.memory_space<vmem>>, vector<1x8x4xf32>
    %17 = vector.shape_cast %16 : vector<1x8x4xf32> to vector<8x4xf32>
    %cst_13 = arith.constant dense<0.000000e+00> : vector<8x512xf32>
    %18 = tpu.matmul %17, %15, %cst_13 {dimension_numbers = #tpu.dot_dimension_numbers<[1], [0], [0], [1], [0, 0, 1, 1], [], []>} : vector<8x4xf32>, vector<4x512xf32>, vector<8x512xf32> -> vector<8x512xf32>
    %19 = arith.addf %11, %18 : vector<8x512xf32>
    %c15_i32 = arith.constant 15 : i32
    %20 = tpu.dynamic_rotate %0 by %c15_i32 dim 1 : vector<4x512xf32>, i32 -> vector<4x512xf32>
    %c2 = arith.constant 2 : index
    %c0_14 = arith.constant 0 : index
    %21 = vector.load %arg7[%c2, %c0_14] : memref<9x512xf32, #tpu.memory_space<vmem>>, vector<1x512xf32>
    %22 = vector.broadcast %21 : vector<1x512xf32> to vector<4x512xf32>
    %23 = arith.mulf %20, %22 : vector<4x512xf32>
    %c2_15 = arith.constant 2 : index
    %c0_16 = arith.constant 0 : index
    %c0_17 = arith.constant 0 : index
    %24 = vector.load %arg2[%c2_15, %c0_16, %c0_17] : memref<9x8x4xf32, #tpu.memory_space<vmem>>, vector<1x8x4xf32>
    %25 = vector.shape_cast %24 : vector<1x8x4xf32> to vector<8x4xf32>
    %cst_18 = arith.constant dense<0.000000e+00> : vector<8x512xf32>
    %26 = tpu.matmul %25, %23, %cst_18 {dimension_numbers = #tpu.dot_dimension_numbers<[1], [0], [0], [1], [0, 0, 1, 1], [], []>} : vector<8x4xf32>, vector<4x512xf32>, vector<8x512xf32> -> vector<8x512xf32>
    %27 = arith.addf %19, %26 : vector<8x512xf32>
    %c1_i32 = arith.constant 1 : i32
    %28 = tpu.dynamic_rotate %0 by %c1_i32 dim 1 : vector<4x512xf32>, i32 -> vector<4x512xf32>
    %c3 = arith.constant 3 : index
    %c0_19 = arith.constant 0 : index
    %29 = vector.load %arg7[%c3, %c0_19] : memref<9x512xf32, #tpu.memory_space<vmem>>, vector<1x512xf32>
    %30 = vector.broadcast %29 : vector<1x512xf32> to vector<4x512xf32>
    %31 = arith.mulf %28, %30 : vector<4x512xf32>
    %c3_20 = arith.constant 3 : index
    %c0_21 = arith.constant 0 : index
    %c0_22 = arith.constant 0 : index
    %32 = vector.load %arg2[%c3_20, %c0_21, %c0_22] : memref<9x8x4xf32, #tpu.memory_space<vmem>>, vector<1x8x4xf32>
    %33 = vector.shape_cast %32 : vector<1x8x4xf32> to vector<8x4xf32>
    %cst_23 = arith.constant dense<0.000000e+00> : vector<8x512xf32>
    %34 = tpu.matmul %33, %31, %cst_23 {dimension_numbers = #tpu.dot_dimension_numbers<[1], [0], [0], [1], [0, 0, 1, 1], [], []>} : vector<8x4xf32>, vector<4x512xf32>, vector<8x512xf32> -> vector<8x512xf32>
    %35 = arith.addf %27, %34 : vector<8x512xf32>
    %c511_i32 = arith.constant 511 : i32
    %36 = tpu.dynamic_rotate %0 by %c511_i32 dim 1 : vector<4x512xf32>, i32 -> vector<4x512xf32>
    %c5 = arith.constant 5 : index
    %c0_24 = arith.constant 0 : index
    %37 = vector.load %arg7[%c5, %c0_24] : memref<9x512xf32, #tpu.memory_space<vmem>>, vector<1x512xf32>
    %38 = vector.broadcast %37 : vector<1x512xf32> to vector<4x512xf32>
    %39 = arith.mulf %36, %38 : vector<4x512xf32>
    %c5_25 = arith.constant 5 : index
    %c0_26 = arith.constant 0 : index
    %c0_27 = arith.constant 0 : index
    %40 = vector.load %arg2[%c5_25, %c0_26, %c0_27] : memref<9x8x4xf32, #tpu.memory_space<vmem>>, vector<1x8x4xf32>
    %41 = vector.shape_cast %40 : vector<1x8x4xf32> to vector<8x4xf32>
    %cst_28 = arith.constant dense<0.000000e+00> : vector<8x512xf32>
    %42 = tpu.matmul %41, %39, %cst_28 {dimension_numbers = #tpu.dot_dimension_numbers<[1], [0], [0], [1], [0, 0, 1, 1], [], []>} : vector<8x4xf32>, vector<4x512xf32>, vector<8x512xf32> -> vector<8x512xf32>
    %43 = arith.addf %35, %42 : vector<8x512xf32>
    %c497_i32 = arith.constant 497 : i32
    %44 = tpu.dynamic_rotate %0 by %c497_i32 dim 1 : vector<4x512xf32>, i32 -> vector<4x512xf32>
    %c6 = arith.constant 6 : index
    %c0_29 = arith.constant 0 : index
    %45 = vector.load %arg7[%c6, %c0_29] : memref<9x512xf32, #tpu.memory_space<vmem>>, vector<1x512xf32>
    %46 = vector.broadcast %45 : vector<1x512xf32> to vector<4x512xf32>
    %47 = arith.mulf %44, %46 : vector<4x512xf32>
    %c6_30 = arith.constant 6 : index
    %c0_31 = arith.constant 0 : index
    %c0_32 = arith.constant 0 : index
    %48 = vector.load %arg2[%c6_30, %c0_31, %c0_32] : memref<9x8x4xf32, #tpu.memory_space<vmem>>, vector<1x8x4xf32>
    %49 = vector.shape_cast %48 : vector<1x8x4xf32> to vector<8x4xf32>
    %cst_33 = arith.constant dense<0.000000e+00> : vector<8x512xf32>
    %50 = tpu.matmul %49, %47, %cst_33 {dimension_numbers = #tpu.dot_dimension_numbers<[1], [0], [0], [1], [0, 0, 1, 1], [], []>} : vector<8x4xf32>, vector<4x512xf32>, vector<8x512xf32> -> vector<8x512xf32>
    %51 = arith.addf %43, %50 : vector<8x512xf32>
    %c496_i32 = arith.constant 496 : i32
    %52 = tpu.dynamic_rotate %0 by %c496_i32 dim 1 : vector<4x512xf32>, i32 -> vector<4x512xf32>
    %c7 = arith.constant 7 : index
    %c0_34 = arith.constant 0 : index
    %53 = vector.load %arg7[%c7, %c0_34] : memref<9x512xf32, #tpu.memory_space<vmem>>, vector<1x512xf32>
    %54 = vector.broadcast %53 : vector<1x512xf32> to vector<4x512xf32>
    %55 = arith.mulf %52, %54 : vector<4x512xf32>
    %c7_35 = arith.constant 7 : index
    %c0_36 = arith.constant 0 : index
    %c0_37 = arith.constant 0 : index
    %56 = vector.load %arg2[%c7_35, %c0_36, %c0_37] : memref<9x8x4xf32, #tpu.memory_space<vmem>>, vector<1x8x4xf32>
    %57 = vector.shape_cast %56 : vector<1x8x4xf32> to vector<8x4xf32>
    %cst_38 = arith.constant dense<0.000000e+00> : vector<8x512xf32>
    %58 = tpu.matmul %57, %55, %cst_38 {dimension_numbers = #tpu.dot_dimension_numbers<[1], [0], [0], [1], [0, 0, 1, 1], [], []>} : vector<8x4xf32>, vector<4x512xf32>, vector<8x512xf32> -> vector<8x512xf32>
    %59 = arith.addf %51, %58 : vector<8x512xf32>
    %c495_i32 = arith.constant 495 : i32
    %60 = tpu.dynamic_rotate %0 by %c495_i32 dim 1 : vector<4x512xf32>, i32 -> vector<4x512xf32>
    %c8 = arith.constant 8 : index
    %c0_39 = arith.constant 0 : index
    %61 = vector.load %arg7[%c8, %c0_39] : memref<9x512xf32, #tpu.memory_space<vmem>>, vector<1x512xf32>
    %62 = vector.broadcast %61 : vector<1x512xf32> to vector<4x512xf32>
    %63 = arith.mulf %60, %62 : vector<4x512xf32>
    %c8_40 = arith.constant 8 : index
    %c0_41 = arith.constant 0 : index
    %c0_42 = arith.constant 0 : index
    %64 = vector.load %arg2[%c8_40, %c0_41, %c0_42] : memref<9x8x4xf32, #tpu.memory_space<vmem>>, vector<1x8x4xf32>
    %65 = vector.shape_cast %64 : vector<1x8x4xf32> to vector<8x4xf32>
    %cst_43 = arith.constant dense<0.000000e+00> : vector<8x512xf32>
    %66 = tpu.matmul %65, %63, %cst_43 {dimension_numbers = #tpu.dot_dimension_numbers<[1], [0], [0], [1], [0, 0, 1, 1], [], []>} : vector<8x4xf32>, vector<4x512xf32>, vector<8x512xf32> -> vector<8x512xf32>
    %67 = arith.addf %59, %66 : vector<8x512xf32>
    %c0_44 = arith.constant 0 : index
    %c0_45 = arith.constant 0 : index
    %68 = vector.load %arg3[%c0_44, %c0_45] : memref<8x1xf32, #tpu.memory_space<vmem>>, vector<8x1xf32>
    %69 = vector.broadcast %68 : vector<8x1xf32> to vector<8x512xf32>
    %70 = arith.addf %67, %69 : vector<8x512xf32>
    %71 = math.tanh %70 : vector<8x512xf32>
    %c4_46 = arith.constant 4 : index
    %c0_47 = arith.constant 0 : index
    %c0_48 = arith.constant 0 : index
    %72 = vector.load %arg4[%c4_46, %c0_47, %c0_48] : memref<9x8x8xf32, #tpu.memory_space<vmem>>, vector<1x8x8xf32>
    %73 = vector.shape_cast %72 : vector<1x8x8xf32> to vector<8x8xf32>
    %cst_49 = arith.constant dense<0.000000e+00> : vector<8x512xf32>
    %74 = tpu.matmul %73, %71, %cst_49 {dimension_numbers = #tpu.dot_dimension_numbers<[1], [0], [0], [1], [0, 0, 1, 1], [], []>} : vector<8x8xf32>, vector<8x512xf32>, vector<8x512xf32> -> vector<8x512xf32>
    %c17_i32_50 = arith.constant 17 : i32
    %75 = tpu.dynamic_rotate %71 by %c17_i32_50 dim 1 : vector<8x512xf32>, i32 -> vector<8x512xf32>
    %c0_51 = arith.constant 0 : index
    %c0_52 = arith.constant 0 : index
    %76 = vector.load %arg7[%c0_51, %c0_52] : memref<9x512xf32, #tpu.memory_space<vmem>>, vector<1x512xf32>
    %77 = vector.broadcast %76 : vector<1x512xf32> to vector<8x512xf32>
    %78 = arith.mulf %75, %77 : vector<8x512xf32>
    %c0_53 = arith.constant 0 : index
    %c0_54 = arith.constant 0 : index
    %c0_55 = arith.constant 0 : index
    %79 = vector.load %arg4[%c0_53, %c0_54, %c0_55] : memref<9x8x8xf32, #tpu.memory_space<vmem>>, vector<1x8x8xf32>
    %80 = vector.shape_cast %79 : vector<1x8x8xf32> to vector<8x8xf32>
    %cst_56 = arith.constant dense<0.000000e+00> : vector<8x512xf32>
    %81 = tpu.matmul %80, %78, %cst_56 {dimension_numbers = #tpu.dot_dimension_numbers<[1], [0], [0], [1], [0, 0, 1, 1], [], []>} : vector<8x8xf32>, vector<8x512xf32>, vector<8x512xf32> -> vector<8x512xf32>
    %82 = arith.addf %74, %81 : vector<8x512xf32>
    %c16_i32_57 = arith.constant 16 : i32
    %83 = tpu.dynamic_rotate %71 by %c16_i32_57 dim 1 : vector<8x512xf32>, i32 -> vector<8x512xf32>
    %c1_58 = arith.constant 1 : index
    %c0_59 = arith.constant 0 : index
    %84 = vector.load %arg7[%c1_58, %c0_59] : memref<9x512xf32, #tpu.memory_space<vmem>>, vector<1x512xf32>
    %85 = vector.broadcast %84 : vector<1x512xf32> to vector<8x512xf32>
    %86 = arith.mulf %83, %85 : vector<8x512xf32>
    %c1_60 = arith.constant 1 : index
    %c0_61 = arith.constant 0 : index
    %c0_62 = arith.constant 0 : index
    %87 = vector.load %arg4[%c1_60, %c0_61, %c0_62] : memref<9x8x8xf32, #tpu.memory_space<vmem>>, vector<1x8x8xf32>
    %88 = vector.shape_cast %87 : vector<1x8x8xf32> to vector<8x8xf32>
    %cst_63 = arith.constant dense<0.000000e+00> : vector<8x512xf32>
    %89 = tpu.matmul %88, %86, %cst_63 {dimension_numbers = #tpu.dot_dimension_numbers<[1], [0], [0], [1], [0, 0, 1, 1], [], []>} : vector<8x8xf32>, vector<8x512xf32>, vector<8x512xf32> -> vector<8x512xf32>
    %90 = arith.addf %82, %89 : vector<8x512xf32>
    %c15_i32_64 = arith.constant 15 : i32
    %91 = tpu.dynamic_rotate %71 by %c15_i32_64 dim 1 : vector<8x512xf32>, i32 -> vector<8x512xf32>
    %c2_65 = arith.constant 2 : index
    %c0_66 = arith.constant 0 : index
    %92 = vector.load %arg7[%c2_65, %c0_66] : memref<9x512xf32, #tpu.memory_space<vmem>>, vector<1x512xf32>
    %93 = vector.broadcast %92 : vector<1x512xf32> to vector<8x512xf32>
    %94 = arith.mulf %91, %93 : vector<8x512xf32>
    %c2_67 = arith.constant 2 : index
    %c0_68 = arith.constant 0 : index
    %c0_69 = arith.constant 0 : index
    %95 = vector.load %arg4[%c2_67, %c0_68, %c0_69] : memref<9x8x8xf32, #tpu.memory_space<vmem>>, vector<1x8x8xf32>
    %96 = vector.shape_cast %95 : vector<1x8x8xf32> to vector<8x8xf32>
    %cst_70 = arith.constant dense<0.000000e+00> : vector<8x512xf32>
    %97 = tpu.matmul %96, %94, %cst_70 {dimension_numbers = #tpu.dot_dimension_numbers<[1], [0], [0], [1], [0, 0, 1, 1], [], []>} : vector<8x8xf32>, vector<8x512xf32>, vector<8x512xf32> -> vector<8x512xf32>
    %98 = arith.addf %90, %97 : vector<8x512xf32>
    %c1_i32_71 = arith.constant 1 : i32
    %99 = tpu.dynamic_rotate %71 by %c1_i32_71 dim 1 : vector<8x512xf32>, i32 -> vector<8x512xf32>
    %c3_72 = arith.constant 3 : index
    %c0_73 = arith.constant 0 : index
    %100 = vector.load %arg7[%c3_72, %c0_73] : memref<9x512xf32, #tpu.memory_space<vmem>>, vector<1x512xf32>
    %101 = vector.broadcast %100 : vector<1x512xf32> to vector<8x512xf32>
    %102 = arith.mulf %99, %101 : vector<8x512xf32>
    %c3_74 = arith.constant 3 : index
    %c0_75 = arith.constant 0 : index
    %c0_76 = arith.constant 0 : index
    %103 = vector.load %arg4[%c3_74, %c0_75, %c0_76] : memref<9x8x8xf32, #tpu.memory_space<vmem>>, vector<1x8x8xf32>
    %104 = vector.shape_cast %103 : vector<1x8x8xf32> to vector<8x8xf32>
    %cst_77 = arith.constant dense<0.000000e+00> : vector<8x512xf32>
    %105 = tpu.matmul %104, %102, %cst_77 {dimension_numbers = #tpu.dot_dimension_numbers<[1], [0], [0], [1], [0, 0, 1, 1], [], []>} : vector<8x8xf32>, vector<8x512xf32>, vector<8x512xf32> -> vector<8x512xf32>
    %106 = arith.addf %98, %105 : vector<8x512xf32>
    %c511_i32_78 = arith.constant 511 : i32
    %107 = tpu.dynamic_rotate %71 by %c511_i32_78 dim 1 : vector<8x512xf32>, i32 -> vector<8x512xf32>
    %c5_79 = arith.constant 5 : index
    %c0_80 = arith.constant 0 : index
    %108 = vector.load %arg7[%c5_79, %c0_80] : memref<9x512xf32, #tpu.memory_space<vmem>>, vector<1x512xf32>
    %109 = vector.broadcast %108 : vector<1x512xf32> to vector<8x512xf32>
    %110 = arith.mulf %107, %109 : vector<8x512xf32>
    %c5_81 = arith.constant 5 : index
    %c0_82 = arith.constant 0 : index
    %c0_83 = arith.constant 0 : index
    %111 = vector.load %arg4[%c5_81, %c0_82, %c0_83] : memref<9x8x8xf32, #tpu.memory_space<vmem>>, vector<1x8x8xf32>
    %112 = vector.shape_cast %111 : vector<1x8x8xf32> to vector<8x8xf32>
    %cst_84 = arith.constant dense<0.000000e+00> : vector<8x512xf32>
    %113 = tpu.matmul %112, %110, %cst_84 {dimension_numbers = #tpu.dot_dimension_numbers<[1], [0], [0], [1], [0, 0, 1, 1], [], []>} : vector<8x8xf32>, vector<8x512xf32>, vector<8x512xf32> -> vector<8x512xf32>
    %114 = arith.addf %106, %113 : vector<8x512xf32>
    %c497_i32_85 = arith.constant 497 : i32
    %115 = tpu.dynamic_rotate %71 by %c497_i32_85 dim 1 : vector<8x512xf32>, i32 -> vector<8x512xf32>
    %c6_86 = arith.constant 6 : index
    %c0_87 = arith.constant 0 : index
    %116 = vector.load %arg7[%c6_86, %c0_87] : memref<9x512xf32, #tpu.memory_space<vmem>>, vector<1x512xf32>
    %117 = vector.broadcast %116 : vector<1x512xf32> to vector<8x512xf32>
    %118 = arith.mulf %115, %117 : vector<8x512xf32>
    %c6_88 = arith.constant 6 : index
    %c0_89 = arith.constant 0 : index
    %c0_90 = arith.constant 0 : index
    %119 = vector.load %arg4[%c6_88, %c0_89, %c0_90] : memref<9x8x8xf32, #tpu.memory_space<vmem>>, vector<1x8x8xf32>
    %120 = vector.shape_cast %119 : vector<1x8x8xf32> to vector<8x8xf32>
    %cst_91 = arith.constant dense<0.000000e+00> : vector<8x512xf32>
    %121 = tpu.matmul %120, %118, %cst_91 {dimension_numbers = #tpu.dot_dimension_numbers<[1], [0], [0], [1], [0, 0, 1, 1], [], []>} : vector<8x8xf32>, vector<8x512xf32>, vector<8x512xf32> -> vector<8x512xf32>
    %122 = arith.addf %114, %121 : vector<8x512xf32>
    %c496_i32_92 = arith.constant 496 : i32
    %123 = tpu.dynamic_rotate %71 by %c496_i32_92 dim 1 : vector<8x512xf32>, i32 -> vector<8x512xf32>
    %c7_93 = arith.constant 7 : index
    %c0_94 = arith.constant 0 : index
    %124 = vector.load %arg7[%c7_93, %c0_94] : memref<9x512xf32, #tpu.memory_space<vmem>>, vector<1x512xf32>
    %125 = vector.broadcast %124 : vector<1x512xf32> to vector<8x512xf32>
    %126 = arith.mulf %123, %125 : vector<8x512xf32>
    %c7_95 = arith.constant 7 : index
    %c0_96 = arith.constant 0 : index
    %c0_97 = arith.constant 0 : index
    %127 = vector.load %arg4[%c7_95, %c0_96, %c0_97] : memref<9x8x8xf32, #tpu.memory_space<vmem>>, vector<1x8x8xf32>
    %128 = vector.shape_cast %127 : vector<1x8x8xf32> to vector<8x8xf32>
    %cst_98 = arith.constant dense<0.000000e+00> : vector<8x512xf32>
    %129 = tpu.matmul %128, %126, %cst_98 {dimension_numbers = #tpu.dot_dimension_numbers<[1], [0], [0], [1], [0, 0, 1, 1], [], []>} : vector<8x8xf32>, vector<8x512xf32>, vector<8x512xf32> -> vector<8x512xf32>
    %130 = arith.addf %122, %129 : vector<8x512xf32>
    %c495_i32_99 = arith.constant 495 : i32
    %131 = tpu.dynamic_rotate %71 by %c495_i32_99 dim 1 : vector<8x512xf32>, i32 -> vector<8x512xf32>
    %c8_100 = arith.constant 8 : index
    %c0_101 = arith.constant 0 : index
    %132 = vector.load %arg7[%c8_100, %c0_101] : memref<9x512xf32, #tpu.memory_space<vmem>>, vector<1x512xf32>
    %133 = vector.broadcast %132 : vector<1x512xf32> to vector<8x512xf32>
    %134 = arith.mulf %131, %133 : vector<8x512xf32>
    %c8_102 = arith.constant 8 : index
    %c0_103 = arith.constant 0 : index
    %c0_104 = arith.constant 0 : index
    %135 = vector.load %arg4[%c8_102, %c0_103, %c0_104] : memref<9x8x8xf32, #tpu.memory_space<vmem>>, vector<1x8x8xf32>
    %136 = vector.shape_cast %135 : vector<1x8x8xf32> to vector<8x8xf32>
    %cst_105 = arith.constant dense<0.000000e+00> : vector<8x512xf32>
    %137 = tpu.matmul %136, %134, %cst_105 {dimension_numbers = #tpu.dot_dimension_numbers<[1], [0], [0], [1], [0, 0, 1, 1], [], []>} : vector<8x8xf32>, vector<8x512xf32>, vector<8x512xf32> -> vector<8x512xf32>
    %138 = arith.addf %130, %137 : vector<8x512xf32>
    %c0_106 = arith.constant 0 : index
    %c0_107 = arith.constant 0 : index
    %139 = vector.load %arg5[%c0_106, %c0_107] : memref<8x1xf32, #tpu.memory_space<vmem>>, vector<8x1xf32>
    %140 = vector.broadcast %139 : vector<8x1xf32> to vector<8x512xf32>
    %141 = arith.addf %138, %140 : vector<8x512xf32>
    %c0_108 = arith.constant 0 : index
    %c0_109 = arith.constant 0 : index
    %142 = vector.load %arg6[%c0_108, %c0_109] : memref<1x512xf32, #tpu.memory_space<vmem>>, vector<1x512xf32>
    %143 = vector.broadcast %142 : vector<1x512xf32> to vector<8x512xf32>
    %144 = arith.mulf %141, %143 : vector<8x512xf32>
    %145 = math.tanh %144 : vector<8x512xf32>
    %c0_110 = arith.constant 0 : index
    %c0_111 = arith.constant 0 : index
    %146 = vector.load %arg8[%c0_110, %c0_111] : memref<512x128xf32, #tpu.memory_space<vmem>>, vector<512x128xf32>
    %cst_112 = arith.constant dense<0.000000e+00> : vector<8x128xf32>
    %147 = tpu.matmul %145, %146, %cst_112 {dimension_numbers = #tpu.dot_dimension_numbers<[1], [0], [0], [1], [0, 0, 1, 1], [], []>} : vector<8x512xf32>, vector<512x128xf32>, vector<8x128xf32> -> vector<8x128xf32>
    %c4_113 = arith.constant 4 : index
    %c0_114 = arith.constant 0 : index
    %c0_115 = arith.constant 0 : index
    %148 = vector.load %arg9[%c4_113, %c0_114, %c0_115] : memref<9x16x8xf32, #tpu.memory_space<vmem>>, vector<1x16x8xf32>
    %149 = vector.shape_cast %148 : vector<1x16x8xf32> to vector<16x8xf32>
    %cst_116 = arith.constant dense<0.000000e+00> : vector<16x128xf32>
    %150 = tpu.matmul %149, %147, %cst_116 {dimension_numbers = #tpu.dot_dimension_numbers<[1], [0], [0], [1], [0, 0, 1, 1], [], []>} : vector<16x8xf32>, vector<8x128xf32>, vector<16x128xf32> -> vector<16x128xf32>
    %c9_i32 = arith.constant 9 : i32
    %151 = tpu.dynamic_rotate %147 by %c9_i32 dim 1 : vector<8x128xf32>, i32 -> vector<8x128xf32>
    %c0_117 = arith.constant 0 : index
    %c0_118 = arith.constant 0 : index
    %152 = vector.load %arg14[%c0_117, %c0_118] : memref<9x128xf32, #tpu.memory_space<vmem>>, vector<1x128xf32>
    %153 = vector.broadcast %152 : vector<1x128xf32> to vector<8x128xf32>
    %154 = arith.mulf %151, %153 : vector<8x128xf32>
    %c0_119 = arith.constant 0 : index
    %c0_120 = arith.constant 0 : index
    %c0_121 = arith.constant 0 : index
    %155 = vector.load %arg9[%c0_119, %c0_120, %c0_121] : memref<9x16x8xf32, #tpu.memory_space<vmem>>, vector<1x16x8xf32>
    %156 = vector.shape_cast %155 : vector<1x16x8xf32> to vector<16x8xf32>
    %cst_122 = arith.constant dense<0.000000e+00> : vector<16x128xf32>
    %157 = tpu.matmul %156, %154, %cst_122 {dimension_numbers = #tpu.dot_dimension_numbers<[1], [0], [0], [1], [0, 0, 1, 1], [], []>} : vector<16x8xf32>, vector<8x128xf32>, vector<16x128xf32> -> vector<16x128xf32>
    %158 = arith.addf %150, %157 : vector<16x128xf32>
    %c8_i32 = arith.constant 8 : i32
    %159 = tpu.dynamic_rotate %147 by %c8_i32 dim 1 : vector<8x128xf32>, i32 -> vector<8x128xf32>
    %c1_123 = arith.constant 1 : index
    %c0_124 = arith.constant 0 : index
    %160 = vector.load %arg14[%c1_123, %c0_124] : memref<9x128xf32, #tpu.memory_space<vmem>>, vector<1x128xf32>
    %161 = vector.broadcast %160 : vector<1x128xf32> to vector<8x128xf32>
    %162 = arith.mulf %159, %161 : vector<8x128xf32>
    %c1_125 = arith.constant 1 : index
    %c0_126 = arith.constant 0 : index
    %c0_127 = arith.constant 0 : index
    %163 = vector.load %arg9[%c1_125, %c0_126, %c0_127] : memref<9x16x8xf32, #tpu.memory_space<vmem>>, vector<1x16x8xf32>
    %164 = vector.shape_cast %163 : vector<1x16x8xf32> to vector<16x8xf32>
    %cst_128 = arith.constant dense<0.000000e+00> : vector<16x128xf32>
    %165 = tpu.matmul %164, %162, %cst_128 {dimension_numbers = #tpu.dot_dimension_numbers<[1], [0], [0], [1], [0, 0, 1, 1], [], []>} : vector<16x8xf32>, vector<8x128xf32>, vector<16x128xf32> -> vector<16x128xf32>
    %166 = arith.addf %158, %165 : vector<16x128xf32>
    %c7_i32 = arith.constant 7 : i32
    %167 = tpu.dynamic_rotate %147 by %c7_i32 dim 1 : vector<8x128xf32>, i32 -> vector<8x128xf32>
    %c2_129 = arith.constant 2 : index
    %c0_130 = arith.constant 0 : index
    %168 = vector.load %arg14[%c2_129, %c0_130] : memref<9x128xf32, #tpu.memory_space<vmem>>, vector<1x128xf32>
    %169 = vector.broadcast %168 : vector<1x128xf32> to vector<8x128xf32>
    %170 = arith.mulf %167, %169 : vector<8x128xf32>
    %c2_131 = arith.constant 2 : index
    %c0_132 = arith.constant 0 : index
    %c0_133 = arith.constant 0 : index
    %171 = vector.load %arg9[%c2_131, %c0_132, %c0_133] : memref<9x16x8xf32, #tpu.memory_space<vmem>>, vector<1x16x8xf32>
    %172 = vector.shape_cast %171 : vector<1x16x8xf32> to vector<16x8xf32>
    %cst_134 = arith.constant dense<0.000000e+00> : vector<16x128xf32>
    %173 = tpu.matmul %172, %170, %cst_134 {dimension_numbers = #tpu.dot_dimension_numbers<[1], [0], [0], [1], [0, 0, 1, 1], [], []>} : vector<16x8xf32>, vector<8x128xf32>, vector<16x128xf32> -> vector<16x128xf32>
    %174 = arith.addf %166, %173 : vector<16x128xf32>
    %c1_i32_135 = arith.constant 1 : i32
    %175 = tpu.dynamic_rotate %147 by %c1_i32_135 dim 1 : vector<8x128xf32>, i32 -> vector<8x128xf32>
    %c3_136 = arith.constant 3 : index
    %c0_137 = arith.constant 0 : index
    %176 = vector.load %arg14[%c3_136, %c0_137] : memref<9x128xf32, #tpu.memory_space<vmem>>, vector<1x128xf32>
    %177 = vector.broadcast %176 : vector<1x128xf32> to vector<8x128xf32>
    %178 = arith.mulf %175, %177 : vector<8x128xf32>
    %c3_138 = arith.constant 3 : index
    %c0_139 = arith.constant 0 : index
    %c0_140 = arith.constant 0 : index
    %179 = vector.load %arg9[%c3_138, %c0_139, %c0_140] : memref<9x16x8xf32, #tpu.memory_space<vmem>>, vector<1x16x8xf32>
    %180 = vector.shape_cast %179 : vector<1x16x8xf32> to vector<16x8xf32>
    %cst_141 = arith.constant dense<0.000000e+00> : vector<16x128xf32>
    %181 = tpu.matmul %180, %178, %cst_141 {dimension_numbers = #tpu.dot_dimension_numbers<[1], [0], [0], [1], [0, 0, 1, 1], [], []>} : vector<16x8xf32>, vector<8x128xf32>, vector<16x128xf32> -> vector<16x128xf32>
    %182 = arith.addf %174, %181 : vector<16x128xf32>
    %c127_i32 = arith.constant 127 : i32
    %183 = tpu.dynamic_rotate %147 by %c127_i32 dim 1 : vector<8x128xf32>, i32 -> vector<8x128xf32>
    %c5_142 = arith.constant 5 : index
    %c0_143 = arith.constant 0 : index
    %184 = vector.load %arg14[%c5_142, %c0_143] : memref<9x128xf32, #tpu.memory_space<vmem>>, vector<1x128xf32>
    %185 = vector.broadcast %184 : vector<1x128xf32> to vector<8x128xf32>
    %186 = arith.mulf %183, %185 : vector<8x128xf32>
    %c5_144 = arith.constant 5 : index
    %c0_145 = arith.constant 0 : index
    %c0_146 = arith.constant 0 : index
    %187 = vector.load %arg9[%c5_144, %c0_145, %c0_146] : memref<9x16x8xf32, #tpu.memory_space<vmem>>, vector<1x16x8xf32>
    %188 = vector.shape_cast %187 : vector<1x16x8xf32> to vector<16x8xf32>
    %cst_147 = arith.constant dense<0.000000e+00> : vector<16x128xf32>
    %189 = tpu.matmul %188, %186, %cst_147 {dimension_numbers = #tpu.dot_dimension_numbers<[1], [0], [0], [1], [0, 0, 1, 1], [], []>} : vector<16x8xf32>, vector<8x128xf32>, vector<16x128xf32> -> vector<16x128xf32>
    %190 = arith.addf %182, %189 : vector<16x128xf32>
    %c121_i32 = arith.constant 121 : i32
    %191 = tpu.dynamic_rotate %147 by %c121_i32 dim 1 : vector<8x128xf32>, i32 -> vector<8x128xf32>
    %c6_148 = arith.constant 6 : index
    %c0_149 = arith.constant 0 : index
    %192 = vector.load %arg14[%c6_148, %c0_149] : memref<9x128xf32, #tpu.memory_space<vmem>>, vector<1x128xf32>
    %193 = vector.broadcast %192 : vector<1x128xf32> to vector<8x128xf32>
    %194 = arith.mulf %191, %193 : vector<8x128xf32>
    %c6_150 = arith.constant 6 : index
    %c0_151 = arith.constant 0 : index
    %c0_152 = arith.constant 0 : index
    %195 = vector.load %arg9[%c6_150, %c0_151, %c0_152] : memref<9x16x8xf32, #tpu.memory_space<vmem>>, vector<1x16x8xf32>
    %196 = vector.shape_cast %195 : vector<1x16x8xf32> to vector<16x8xf32>
    %cst_153 = arith.constant dense<0.000000e+00> : vector<16x128xf32>
    %197 = tpu.matmul %196, %194, %cst_153 {dimension_numbers = #tpu.dot_dimension_numbers<[1], [0], [0], [1], [0, 0, 1, 1], [], []>} : vector<16x8xf32>, vector<8x128xf32>, vector<16x128xf32> -> vector<16x128xf32>
    %198 = arith.addf %190, %197 : vector<16x128xf32>
    %c120_i32 = arith.constant 120 : i32
    %199 = tpu.dynamic_rotate %147 by %c120_i32 dim 1 : vector<8x128xf32>, i32 -> vector<8x128xf32>
    %c7_154 = arith.constant 7 : index
    %c0_155 = arith.constant 0 : index
    %200 = vector.load %arg14[%c7_154, %c0_155] : memref<9x128xf32, #tpu.memory_space<vmem>>, vector<1x128xf32>
    %201 = vector.broadcast %200 : vector<1x128xf32> to vector<8x128xf32>
    %202 = arith.mulf %199, %201 : vector<8x128xf32>
    %c7_156 = arith.constant 7 : index
    %c0_157 = arith.constant 0 : index
    %c0_158 = arith.constant 0 : index
    %203 = vector.load %arg9[%c7_156, %c0_157, %c0_158] : memref<9x16x8xf32, #tpu.memory_space<vmem>>, vector<1x16x8xf32>
    %204 = vector.shape_cast %203 : vector<1x16x8xf32> to vector<16x8xf32>
    %cst_159 = arith.constant dense<0.000000e+00> : vector<16x128xf32>
    %205 = tpu.matmul %204, %202, %cst_159 {dimension_numbers = #tpu.dot_dimension_numbers<[1], [0], [0], [1], [0, 0, 1, 1], [], []>} : vector<16x8xf32>, vector<8x128xf32>, vector<16x128xf32> -> vector<16x128xf32>
    %206 = arith.addf %198, %205 : vector<16x128xf32>
    %c119_i32 = arith.constant 119 : i32
    %207 = tpu.dynamic_rotate %147 by %c119_i32 dim 1 : vector<8x128xf32>, i32 -> vector<8x128xf32>
    %c8_160 = arith.constant 8 : index
    %c0_161 = arith.constant 0 : index
    %208 = vector.load %arg14[%c8_160, %c0_161] : memref<9x128xf32, #tpu.memory_space<vmem>>, vector<1x128xf32>
    %209 = vector.broadcast %208 : vector<1x128xf32> to vector<8x128xf32>
    %210 = arith.mulf %207, %209 : vector<8x128xf32>
    %c8_162 = arith.constant 8 : index
    %c0_163 = arith.constant 0 : index
    %c0_164 = arith.constant 0 : index
    %211 = vector.load %arg9[%c8_162, %c0_163, %c0_164] : memref<9x16x8xf32, #tpu.memory_space<vmem>>, vector<1x16x8xf32>
    %212 = vector.shape_cast %211 : vector<1x16x8xf32> to vector<16x8xf32>
    %cst_165 = arith.constant dense<0.000000e+00> : vector<16x128xf32>
    %213 = tpu.matmul %212, %210, %cst_165 {dimension_numbers = #tpu.dot_dimension_numbers<[1], [0], [0], [1], [0, 0, 1, 1], [], []>} : vector<16x8xf32>, vector<8x128xf32>, vector<16x128xf32> -> vector<16x128xf32>
    %214 = arith.addf %206, %213 : vector<16x128xf32>
    %c0_166 = arith.constant 0 : index
    %c0_167 = arith.constant 0 : index
    %215 = vector.load %arg10[%c0_166, %c0_167] : memref<16x1xf32, #tpu.memory_space<vmem>>, vector<16x1xf32>
    %216 = vector.broadcast %215 : vector<16x1xf32> to vector<16x128xf32>
    %217 = arith.addf %214, %216 : vector<16x128xf32>
    %218 = math.tanh %217 : vector<16x128xf32>
    %c4_168 = arith.constant 4 : index
    %c0_169 = arith.constant 0 : index
    %c0_170 = arith.constant 0 : index
    %219 = vector.load %arg11[%c4_168, %c0_169, %c0_170] : memref<9x16x16xf32, #tpu.memory_space<vmem>>, vector<1x16x16xf32>
    %220 = vector.shape_cast %219 : vector<1x16x16xf32> to vector<16x16xf32>
    %cst_171 = arith.constant dense<0.000000e+00> : vector<16x128xf32>
    %221 = tpu.matmul %220, %218, %cst_171 {dimension_numbers = #tpu.dot_dimension_numbers<[1], [0], [0], [1], [0, 0, 1, 1], [], []>} : vector<16x16xf32>, vector<16x128xf32>, vector<16x128xf32> -> vector<16x128xf32>
    %c9_i32_172 = arith.constant 9 : i32
    %222 = tpu.dynamic_rotate %218 by %c9_i32_172 dim 1 : vector<16x128xf32>, i32 -> vector<16x128xf32>
    %c0_173 = arith.constant 0 : index
    %c0_174 = arith.constant 0 : index
    %223 = vector.load %arg14[%c0_173, %c0_174] : memref<9x128xf32, #tpu.memory_space<vmem>>, vector<1x128xf32>
    %224 = vector.broadcast %223 : vector<1x128xf32> to vector<16x128xf32>
    %225 = arith.mulf %222, %224 : vector<16x128xf32>
    %c0_175 = arith.constant 0 : index
    %c0_176 = arith.constant 0 : index
    %c0_177 = arith.constant 0 : index
    %226 = vector.load %arg11[%c0_175, %c0_176, %c0_177] : memref<9x16x16xf32, #tpu.memory_space<vmem>>, vector<1x16x16xf32>
    %227 = vector.shape_cast %226 : vector<1x16x16xf32> to vector<16x16xf32>
    %cst_178 = arith.constant dense<0.000000e+00> : vector<16x128xf32>
    %228 = tpu.matmul %227, %225, %cst_178 {dimension_numbers = #tpu.dot_dimension_numbers<[1], [0], [0], [1], [0, 0, 1, 1], [], []>} : vector<16x16xf32>, vector<16x128xf32>, vector<16x128xf32> -> vector<16x128xf32>
    %229 = arith.addf %221, %228 : vector<16x128xf32>
    %c8_i32_179 = arith.constant 8 : i32
    %230 = tpu.dynamic_rotate %218 by %c8_i32_179 dim 1 : vector<16x128xf32>, i32 -> vector<16x128xf32>
    %c1_180 = arith.constant 1 : index
    %c0_181 = arith.constant 0 : index
    %231 = vector.load %arg14[%c1_180, %c0_181] : memref<9x128xf32, #tpu.memory_space<vmem>>, vector<1x128xf32>
    %232 = vector.broadcast %231 : vector<1x128xf32> to vector<16x128xf32>
    %233 = arith.mulf %230, %232 : vector<16x128xf32>
    %c1_182 = arith.constant 1 : index
    %c0_183 = arith.constant 0 : index
    %c0_184 = arith.constant 0 : index
    %234 = vector.load %arg11[%c1_182, %c0_183, %c0_184] : memref<9x16x16xf32, #tpu.memory_space<vmem>>, vector<1x16x16xf32>
    %235 = vector.shape_cast %234 : vector<1x16x16xf32> to vector<16x16xf32>
    %cst_185 = arith.constant dense<0.000000e+00> : vector<16x128xf32>
    %236 = tpu.matmul %235, %233, %cst_185 {dimension_numbers = #tpu.dot_dimension_numbers<[1], [0], [0], [1], [0, 0, 1, 1], [], []>} : vector<16x16xf32>, vector<16x128xf32>, vector<16x128xf32> -> vector<16x128xf32>
    %237 = arith.addf %229, %236 : vector<16x128xf32>
    %c7_i32_186 = arith.constant 7 : i32
    %238 = tpu.dynamic_rotate %218 by %c7_i32_186 dim 1 : vector<16x128xf32>, i32 -> vector<16x128xf32>
    %c2_187 = arith.constant 2 : index
    %c0_188 = arith.constant 0 : index
    %239 = vector.load %arg14[%c2_187, %c0_188] : memref<9x128xf32, #tpu.memory_space<vmem>>, vector<1x128xf32>
    %240 = vector.broadcast %239 : vector<1x128xf32> to vector<16x128xf32>
    %241 = arith.mulf %238, %240 : vector<16x128xf32>
    %c2_189 = arith.constant 2 : index
    %c0_190 = arith.constant 0 : index
    %c0_191 = arith.constant 0 : index
    %242 = vector.load %arg11[%c2_189, %c0_190, %c0_191] : memref<9x16x16xf32, #tpu.memory_space<vmem>>, vector<1x16x16xf32>
    %243 = vector.shape_cast %242 : vector<1x16x16xf32> to vector<16x16xf32>
    %cst_192 = arith.constant dense<0.000000e+00> : vector<16x128xf32>
    %244 = tpu.matmul %243, %241, %cst_192 {dimension_numbers = #tpu.dot_dimension_numbers<[1], [0], [0], [1], [0, 0, 1, 1], [], []>} : vector<16x16xf32>, vector<16x128xf32>, vector<16x128xf32> -> vector<16x128xf32>
    %245 = arith.addf %237, %244 : vector<16x128xf32>
    %c1_i32_193 = arith.constant 1 : i32
    %246 = tpu.dynamic_rotate %218 by %c1_i32_193 dim 1 : vector<16x128xf32>, i32 -> vector<16x128xf32>
    %c3_194 = arith.constant 3 : index
    %c0_195 = arith.constant 0 : index
    %247 = vector.load %arg14[%c3_194, %c0_195] : memref<9x128xf32, #tpu.memory_space<vmem>>, vector<1x128xf32>
    %248 = vector.broadcast %247 : vector<1x128xf32> to vector<16x128xf32>
    %249 = arith.mulf %246, %248 : vector<16x128xf32>
    %c3_196 = arith.constant 3 : index
    %c0_197 = arith.constant 0 : index
    %c0_198 = arith.constant 0 : index
    %250 = vector.load %arg11[%c3_196, %c0_197, %c0_198] : memref<9x16x16xf32, #tpu.memory_space<vmem>>, vector<1x16x16xf32>
    %251 = vector.shape_cast %250 : vector<1x16x16xf32> to vector<16x16xf32>
    %cst_199 = arith.constant dense<0.000000e+00> : vector<16x128xf32>
    %252 = tpu.matmul %251, %249, %cst_199 {dimension_numbers = #tpu.dot_dimension_numbers<[1], [0], [0], [1], [0, 0, 1, 1], [], []>} : vector<16x16xf32>, vector<16x128xf32>, vector<16x128xf32> -> vector<16x128xf32>
    %253 = arith.addf %245, %252 : vector<16x128xf32>
    %c127_i32_200 = arith.constant 127 : i32
    %254 = tpu.dynamic_rotate %218 by %c127_i32_200 dim 1 : vector<16x128xf32>, i32 -> vector<16x128xf32>
    %c5_201 = arith.constant 5 : index
    %c0_202 = arith.constant 0 : index
    %255 = vector.load %arg14[%c5_201, %c0_202] : memref<9x128xf32, #tpu.memory_space<vmem>>, vector<1x128xf32>
    %256 = vector.broadcast %255 : vector<1x128xf32> to vector<16x128xf32>
    %257 = arith.mulf %254, %256 : vector<16x128xf32>
    %c5_203 = arith.constant 5 : index
    %c0_204 = arith.constant 0 : index
    %c0_205 = arith.constant 0 : index
    %258 = vector.load %arg11[%c5_203, %c0_204, %c0_205] : memref<9x16x16xf32, #tpu.memory_space<vmem>>, vector<1x16x16xf32>
    %259 = vector.shape_cast %258 : vector<1x16x16xf32> to vector<16x16xf32>
    %cst_206 = arith.constant dense<0.000000e+00> : vector<16x128xf32>
    %260 = tpu.matmul %259, %257, %cst_206 {dimension_numbers = #tpu.dot_dimension_numbers<[1], [0], [0], [1], [0, 0, 1, 1], [], []>} : vector<16x16xf32>, vector<16x128xf32>, vector<16x128xf32> -> vector<16x128xf32>
    %261 = arith.addf %253, %260 : vector<16x128xf32>
    %c121_i32_207 = arith.constant 121 : i32
    %262 = tpu.dynamic_rotate %218 by %c121_i32_207 dim 1 : vector<16x128xf32>, i32 -> vector<16x128xf32>
    %c6_208 = arith.constant 6 : index
    %c0_209 = arith.constant 0 : index
    %263 = vector.load %arg14[%c6_208, %c0_209] : memref<9x128xf32, #tpu.memory_space<vmem>>, vector<1x128xf32>
    %264 = vector.broadcast %263 : vector<1x128xf32> to vector<16x128xf32>
    %265 = arith.mulf %262, %264 : vector<16x128xf32>
    %c6_210 = arith.constant 6 : index
    %c0_211 = arith.constant 0 : index
    %c0_212 = arith.constant 0 : index
    %266 = vector.load %arg11[%c6_210, %c0_211, %c0_212] : memref<9x16x16xf32, #tpu.memory_space<vmem>>, vector<1x16x16xf32>
    %267 = vector.shape_cast %266 : vector<1x16x16xf32> to vector<16x16xf32>
    %cst_213 = arith.constant dense<0.000000e+00> : vector<16x128xf32>
    %268 = tpu.matmul %267, %265, %cst_213 {dimension_numbers = #tpu.dot_dimension_numbers<[1], [0], [0], [1], [0, 0, 1, 1], [], []>} : vector<16x16xf32>, vector<16x128xf32>, vector<16x128xf32> -> vector<16x128xf32>
    %269 = arith.addf %261, %268 : vector<16x128xf32>
    %c120_i32_214 = arith.constant 120 : i32
    %270 = tpu.dynamic_rotate %218 by %c120_i32_214 dim 1 : vector<16x128xf32>, i32 -> vector<16x128xf32>
    %c7_215 = arith.constant 7 : index
    %c0_216 = arith.constant 0 : index
    %271 = vector.load %arg14[%c7_215, %c0_216] : memref<9x128xf32, #tpu.memory_space<vmem>>, vector<1x128xf32>
    %272 = vector.broadcast %271 : vector<1x128xf32> to vector<16x128xf32>
    %273 = arith.mulf %270, %272 : vector<16x128xf32>
    %c7_217 = arith.constant 7 : index
    %c0_218 = arith.constant 0 : index
    %c0_219 = arith.constant 0 : index
    %274 = vector.load %arg11[%c7_217, %c0_218, %c0_219] : memref<9x16x16xf32, #tpu.memory_space<vmem>>, vector<1x16x16xf32>
    %275 = vector.shape_cast %274 : vector<1x16x16xf32> to vector<16x16xf32>
    %cst_220 = arith.constant dense<0.000000e+00> : vector<16x128xf32>
    %276 = tpu.matmul %275, %273, %cst_220 {dimension_numbers = #tpu.dot_dimension_numbers<[1], [0], [0], [1], [0, 0, 1, 1], [], []>} : vector<16x16xf32>, vector<16x128xf32>, vector<16x128xf32> -> vector<16x128xf32>
    %277 = arith.addf %269, %276 : vector<16x128xf32>
    %c119_i32_221 = arith.constant 119 : i32
    %278 = tpu.dynamic_rotate %218 by %c119_i32_221 dim 1 : vector<16x128xf32>, i32 -> vector<16x128xf32>
    %c8_222 = arith.constant 8 : index
    %c0_223 = arith.constant 0 : index
    %279 = vector.load %arg14[%c8_222, %c0_223] : memref<9x128xf32, #tpu.memory_space<vmem>>, vector<1x128xf32>
    %280 = vector.broadcast %279 : vector<1x128xf32> to vector<16x128xf32>
    %281 = arith.mulf %278, %280 : vector<16x128xf32>
    %c8_224 = arith.constant 8 : index
    %c0_225 = arith.constant 0 : index
    %c0_226 = arith.constant 0 : index
    %282 = vector.load %arg11[%c8_224, %c0_225, %c0_226] : memref<9x16x16xf32, #tpu.memory_space<vmem>>, vector<1x16x16xf32>
    %283 = vector.shape_cast %282 : vector<1x16x16xf32> to vector<16x16xf32>
    %cst_227 = arith.constant dense<0.000000e+00> : vector<16x128xf32>
    %284 = tpu.matmul %283, %281, %cst_227 {dimension_numbers = #tpu.dot_dimension_numbers<[1], [0], [0], [1], [0, 0, 1, 1], [], []>} : vector<16x16xf32>, vector<16x128xf32>, vector<16x128xf32> -> vector<16x128xf32>
    %285 = arith.addf %277, %284 : vector<16x128xf32>
    %c0_228 = arith.constant 0 : index
    %c0_229 = arith.constant 0 : index
    %286 = vector.load %arg12[%c0_228, %c0_229] : memref<16x1xf32, #tpu.memory_space<vmem>>, vector<16x1xf32>
    %287 = vector.broadcast %286 : vector<16x1xf32> to vector<16x128xf32>
    %288 = arith.addf %285, %287 : vector<16x128xf32>
    %c0_230 = arith.constant 0 : index
    %c0_231 = arith.constant 0 : index
    %289 = vector.load %arg13[%c0_230, %c0_231] : memref<16x128xf32, #tpu.memory_space<vmem>>, vector<16x128xf32>
    %290 = arith.mulf %288, %289 : vector<16x128xf32>
    %291 = math.tanh %290 : vector<16x128xf32>
    %c0_232 = arith.constant 0 : index
    %c0_233 = arith.constant 0 : index
    %292 = vector.load %arg15[%c0_232, %c0_233] : memref<128x32xf32, #tpu.memory_space<vmem>>, vector<128x32xf32>
    %cst_234 = arith.constant dense<0.000000e+00> : vector<16x32xf32>
    %293 = tpu.matmul %291, %292, %cst_234 {dimension_numbers = #tpu.dot_dimension_numbers<[1], [0], [0], [1], [0, 0, 1, 1], [], []>} : vector<16x128xf32>, vector<128x32xf32>, vector<16x32xf32> -> vector<16x32xf32>
    %294 = math.tanh %293 : vector<16x32xf32>
    %c0_235 = arith.constant 0 : index
    %c0_236 = arith.constant 0 : index
    %295 = vector.load %arg16[%c0_235, %c0_236] : memref<16x32xf32, #tpu.memory_space<vmem>>, vector<16x32xf32>
    tpu.vector_store %arg16[%c0_235, %c0_236], %294 {strides = array<i32>} : memref<16x32xf32, #tpu.memory_space<vmem>>, vector<16x32xf32>,
    return
  }
  func.func @transform_0(%arg0: i32) -> (i32, i32) {
    %c0_i32 = arith.constant 0 : i32
    %c0_i32_0 = arith.constant 0 : i32
    %c0_i32_1 = arith.constant 0 : i32
    return %c0_i32, %c0_i32_0 : i32, i32
  }
  func.func @transform_1(%arg0: i32) -> (i32, i32, i32) {
    %c0_i32 = arith.constant 0 : i32
    %c0_i32_0 = arith.constant 0 : i32
    %c0_i32_1 = arith.constant 0 : i32
    %c0_i32_2 = arith.constant 0 : i32
    return %c0_i32, %c0_i32_0, %c0_i32_1 : i32, i32, i32
  }
  func.func @transform_2(%arg0: i32) -> (i32, i32) {
    %c0_i32 = arith.constant 0 : i32
    %c0_i32_0 = arith.constant 0 : i32
    %c0_i32_1 = arith.constant 0 : i32
    return %c0_i32, %c0_i32_0 : i32, i32
  }
  func.func @transform_3(%arg0: i32) -> (i32, i32, i32) {
    %c0_i32 = arith.constant 0 : i32
    %c0_i32_0 = arith.constant 0 : i32
    %c0_i32_1 = arith.constant 0 : i32
    %c0_i32_2 = arith.constant 0 : i32
    return %c0_i32, %c0_i32_0, %c0_i32_1 : i32, i32, i32
  }
  func.func @transform_4(%arg0: i32) -> (i32, i32) {
    %c0_i32 = arith.constant 0 : i32
    %c0_i32_0 = arith.constant 0 : i32
    %c0_i32_1 = arith.constant 0 : i32
    return %c0_i32, %c0_i32_0 : i32, i32
  }
  func.func @transform_5(%arg0: i32) -> (i32, i32) {
    %c0_i32 = arith.constant 0 : i32
    %c0_i32_0 = arith.constant 0 : i32
    %c0_i32_1 = arith.constant 0 : i32
    return %c0_i32, %c0_i32_0 : i32, i32
  }
  func.func @transform_6(%arg0: i32) -> (i32, i32) {
    %c0_i32 = arith.constant 0 : i32
    %c0_i32_0 = arith.constant 0 : i32
    %c0_i32_1 = arith.constant 0 : i32
    return %c0_i32, %c0_i32_0 : i32, i32
  }
  func.func @transform_7(%arg0: i32) -> (i32, i32) {
    %c0_i32 = arith.constant 0 : i32
    %c0_i32_0 = arith.constant 0 : i32
    %c0_i32_1 = arith.constant 0 : i32
    return %c0_i32, %c0_i32_0 : i32, i32
  }
  func.func @transform_8(%arg0: i32) -> (i32, i32, i32) {
    %c0_i32 = arith.constant 0 : i32
    %c0_i32_0 = arith.constant 0 : i32
    %c0_i32_1 = arith.constant 0 : i32
    %c0_i32_2 = arith.constant 0 : i32
    return %c0_i32, %c0_i32_0, %c0_i32_1 : i32, i32, i32
  }
  func.func @transform_9(%arg0: i32) -> (i32, i32) {
    %c0_i32 = arith.constant 0 : i32
    %c0_i32_0 = arith.constant 0 : i32
    %c0_i32_1 = arith.constant 0 : i32
    return %c0_i32, %c0_i32_0 : i32, i32
  }
  func.func @transform_10(%arg0: i32) -> (i32, i32, i32) {
    %c0_i32 = arith.constant 0 : i32
    %c0_i32_0 = arith.constant 0 : i32
    %c0_i32_1 = arith.constant 0 : i32
    %c0_i32_2 = arith.constant 0 : i32
    return %c0_i32, %c0_i32_0, %c0_i32_1 : i32, i32, i32
  }
  func.func @transform_11(%arg0: i32) -> (i32, i32) {
    %c0_i32 = arith.constant 0 : i32
    %c0_i32_0 = arith.constant 0 : i32
    %c0_i32_1 = arith.constant 0 : i32
    return %c0_i32, %c0_i32_0 : i32, i32
  }
  func.func @transform_12(%arg0: i32) -> (i32, i32) {
    %c0_i32 = arith.constant 0 : i32
    %c0_i32_0 = arith.constant 0 : i32
    %c0_i32_1 = arith.constant 0 : i32
    return %c0_i32, %c0_i32_0 : i32, i32
  }
  func.func @transform_13(%arg0: i32) -> (i32, i32) {
    %c0_i32 = arith.constant 0 : i32
    %c0_i32_0 = arith.constant 0 : i32
    %c0_i32_1 = arith.constant 0 : i32
    return %c0_i32, %c0_i32_0 : i32, i32
  }
  func.func @transform_14(%arg0: i32) -> (i32, i32) {
    %c0_i32 = arith.constant 0 : i32
    %c0_i32_0 = arith.constant 0 : i32
    %c0_i32_1 = arith.constant 0 : i32
    return %c0_i32, %c0_i32_0 : i32, i32
  }
  func.func @transform_15(%arg0: i32) -> (i32, i32) {
    %c0_i32 = arith.constant 0 : i32
    %c0_i32_0 = arith.constant 0 : i32
    %c0_i32_1 = arith.constant 0 : i32
    return %c0_i32, %c0_i32_0 : i32, i32
  }
}

</mosaic_0001>

<bundles_post_ra>
// kernel: tile.8
= control target key start
LH: loop header
LB: loop body
LE: loop exit
PB: predicated region body
PF: predicated region fallthrough
CT: control target
= control target key end

     0   :  { %s40_s0 = inlined_call_operand.vmem [shape: f32[16], index: 0, kind: input, shape index: {}]   ;;  %s41_s1 = inlined_call_operand.vmem [shape: f32[32,16], index: 1, kind: output, shape index: {}]  }
   0x1   :  { %v4_v0 = vld [vmem:[%s40_s0] ss:$0 sm:$0xff] }
   0x2   :  { %5 = vst [vmem:[%s41_s1] sm:$0xff] %v4_v0  ;;  %12 = vst [vmem:[%s41_s1 + $0x8] sm:$0xff] %v4_v0 }
   0x3   :  { %13 = vst [vmem:[%s41_s1 + $0x10] sm:$0xff] %v4_v0  ;;  %14 = vst [vmem:[%s41_s1 + $0x18] sm:$0xff] %v4_v0 }

// kernel: tile.9
= control target key start
LH: loop header
LB: loop body
LE: loop exit
PB: predicated region body
PF: predicated region fallthrough
CT: control target
= control target key end

     0   :  { %s89_s8 = smov 112   ;;  %s90_s11 = smov 80   ;;  %vm3_vm0 = vcmask 130048   ;;  %vm9_vm1 = vcmask 1048448   ;;  %vm15_vm2 = vcmask 917248   ;;  %vm21_vm3 = vcmask 786048   ;;  %s142_s0 = inlined_call_operand.vmem [shape: f32[32,16], index: 0, kind: input, shape index: {}]   ;;  %s143_s1 = inlined_call_operand.vmem [shape: f32[1,512], index: 1, kind: output, shape index: {}]  }
   0x1   :  { %v72_v0 = vld [vmem:[%s142_s0 + $0x7] ss:$8 sm:$0xf]   ;;  %v74_v1 = vld [vmem:[%s142_s0 + $0x5] ss:$8 sm:$0xf]  }
   0x2   :  { %7 = vrot.lane.b32.xlu0 %v72_v0, %s89_s8  ;;  %19 = vrot.lane.b32.xlu1 %v74_v1, %s90_s11  ;;  %v73_v2 = vld [vmem:[%s142_s0 + $0x6] ss:$8 sm:$0xf]   ;;  %v75_v3 = vld [vmem:[%s142_s0 + $0x4] ss:$8 sm:$0xf]  }
   0x3   :  { %s91_s16 = smov 96   ;;  %v2_v4 = vld [vmem:[%s142_s0] ss:$8 sm:$0xf]   ;;  %s92_s19 = smov 64   ;;  %vm27_vm4 = vcmask 654848  }
   0x4   :  { %v76_v5 = vld [vmem:[%s142_s0 + $0x3] ss:$8 sm:$0xf]   ;;  %4 = vst.msk [vmem:[#allocation0] ss:$8 sm:$0xf] %vm3_vm0, %v2_v4  }
   0x5   :  { %v77_v6 = vld [vmem:[%s142_s0 + $0x2] ss:$8 sm:$0xf]   ;;  %s93_s24 = smov 48   ;;  %s94_s25 = smov 32   ;;  %vm33_vm5 = vcmask 523648  }
   0x6   :  { %13 = vrot.lane.b32.xlu0 %v73_v2, %s91_s16  ;;  %25 = vrot.lane.b32.xlu1 %v75_v3, %s92_s19  ;;  %v78_v7 = vld [vmem:[%s142_s0 + $0x1] ss:$8 sm:$0xf]   ;;  %s95_s0 = smov 16   ;;  %vm39_vm6 = vcmask 392448   ;;  %vm45_vm7 = vcmask 261248  }
   0xa   :  { %31 = vrot.lane.b32.xlu0 %v76_v5, %s93_s24  ;;  %37 = vrot.lane.b32.xlu1 %v77_v6, %s94_s25 }
   0xe   :  { %43 = vrot.lane.b32.xlu0 %v78_v7, %s95_s0 }
  0x74   :  { %v8_v8 = vpop.permute.xlu0 %7   ;;  %v20_v9 = vpop.permute.xlu1 %19  }
  0x75   :  { %10 = vst.msk [vmem:[#allocation0] ss:$8 sm:$0xf] %vm9_vm1, %v8_v8  }
  0x78   :  { %v14_v10 = vpop.permute.xlu0 %13   ;;  %v26_v11 = vpop.permute.xlu1 %25  }
  0x79   :  { %16 = vst.msk [vmem:[#allocation0] ss:$8 sm:$0xf] %vm15_vm2, %v14_v10  }
  0x7a   :  { %22 = vst.msk [vmem:[#allocation0] ss:$8 sm:$0xf] %vm21_vm3, %v20_v9  }
  0x7b   :  { %28 = vst.msk [vmem:[#allocation0] ss:$8 sm:$0xf] %vm27_vm4, %v26_v11  }
  0x7c   :  { %v32_v12 = vpop.permute.xlu0 %31   ;;  %v38_v13 = vpop.permute.xlu1 %37  }
  0x7d   :  { %34 = vst.msk [vmem:[#allocation0] ss:$8 sm:$0xf] %vm33_vm5, %v32_v12  }
  0x7e   :  { %40 = vst.msk [vmem:[#allocation0] ss:$8 sm:$0xf] %vm39_vm6, %v38_v13  }
  0x80   :  { %v44_v14 = vpop.permute.xlu0 %43  }
  0x81   :  { %46 = vst.msk [vmem:[#allocation0] ss:$8 sm:$0xf] %vm45_vm7, %v44_v14  }
  0x88   :  { %v50_v15 = vld [vmem:[#allocation0] sm:$0x1]  ;;  %v54_v16 = vld [vmem:[#allocation0 + $0x8] sm:$0x1]  ;;  %v59_v17 = vld [vmem:[#allocation0 + $0x10] sm:$0x1] }
  0x89   :  { %52 = vst [vmem:[%s143_s1] sm:$0x1] %v50_v15  ;;  %79 = vst [vmem:[%s143_s1 + $0x1] sm:$0x1] %v54_v16  ;;  %v65_v18 = vld [vmem:[#allocation0 + $0x18] sm:$0x1] }
  0x8a   :  { %80 = vst [vmem:[%s143_s1 + $0x2] sm:$0x1] %v59_v17  ;;  %81 = vst [vmem:[%s143_s1 + $0x3] sm:$0x1] %v65_v18 }

// kernel: motion_model_forward.1
= control target key start
LH: loop header
LB: loop body
LE: loop exit
PB: predicated region body
PF: predicated region fallthrough
CT: control target
= control target key end

     0   :  { %v6100_v2 = vmov 0.0   ;;  %s6101_s22 = smov 17   ;;  %s6103_s23 = smov 15   ;;  %v6109_v5 = vmov 0   ;;  %v68_v7 = vlaneseq  ;;  %vm106_vm1 = vcmask 1043456   ;;  %s7337_s0 = inlined_call_operand.vmem [shape: f32[4,512], index: 0, kind: input, shape index: {}]   ;;  %s7338_s2 = inlined_call_operand.vmem [shape: f32[8,1], index: 2, kind: input, shape index: {}]   ;;  %s7339_s6 = inlined_call_operand.vmem [shape: f32[9,512], index: 6, kind: input, shape index: {}]   ;;  %s7340_s1 = inlined_call_operand.vmem [shape: f32[9,8,4], index: 1, kind: input, shape index: {}]   ;;  %s7341_s4 = inlined_call_operand.vmem [shape: f32[8,1], index: 4, kind: input, shape index: {}]   ;;  %s7342_s3 = inlined_call_operand.vmem [shape: f32[9,8,8], index: 3, kind: input, shape index: {}]   ;;  %s7343_s7 = inlined_call_operand.vmem [shape: f32[512,128], index: 7, kind: input, shape index: {}]   ;;  %s7344_s5 = inlined_call_operand.vmem [shape: f32[1,512], index: 5, kind: input, shape index: {}]   ;;  %s7345_s8 = inlined_call_operand.vmem [shape: f32[9,16,8], index: 8, kind: input, shape index: {}]   ;;  %s7346_s9 = inlined_call_operand.vmem [shape: f32[16,1], index: 9, kind: input, shape index: {}]   ;;  %s7347_s13 = inlined_call_operand.vmem [shape: f32[9,128], index: 13, kind: input, shape index: {}]   ;;  %s7348_s10 = inlined_call_operand.vmem [shape: f32[9,16,16], index: 10, kind: input, shape index: {}]   ;;  %s7349_s11 = inlined_call_operand.vmem [shape: f32[16,1], index: 11, kind: input, shape index: {}]   ;;  %s7350_s14 = inlined_call_operand.vmem [shape: f32[128,32], index: 14, kind: input, shape index: {}]   ;;  %s7351_s12 = inlined_call_operand.vmem [shape: f32[16,128], index: 12, kind: input, shape index: {}]   ;;  %s7352_s15 = inlined_call_operand.vmem [shape: f32[16,32], index: 15, kind: output, shape index: {}]  }
   0x1   :  { %v6199_v0 = vld [vmem:[%s7337_s0] sm:$0xff]  ;;  %v6204_v1 = vld [vmem:[%s7337_s0 + $0x8] sm:$0xff]  ;;  %183 = vmatprep.mubr.f32.mxu1 %v6100_v2  ;;  %941 = vmatprep.mubr.f32.mxu0 %v6100_v2  ;;  %s6102_s0 = smov 16   ;;  %s6104_s24 = smov 1   ;;  %vm102_vm2 = vcmask 31744   ;;  %vm1868_vm10 = vcmask 64512  }
   0x2   :  { %60 = vrot.lane.b32.xlu0 %v6199_v0, %s6101_s22  ;;  %v6212_v3 = vcombine.high %v6204_v1, %v6204_v1  ;;  %v6216_v4 = vcombine.high %v6199_v0, %v6199_v0  ;;  %s6105_s25 = smov 127   ;;  %s6106_s26 = smov 113   ;;  %v1835_v6 = vld [vmem:[%s7338_s2] sm:$0xff]  ;;  %6069 = vset.pattern.permute.xlu1 %v6109_v5  ;;  %v78_v8 = vshrl.u32 %v68_v7, 7  ;;  %v6283_v9 = vand.u32 127, %v68_v7  ;;  %v5373_v57 = vld [vmem:[%s7340_s1 + $0x8] sm:$0xff] }
   0x3   :  { %s6107_s27 = smov 112   ;;  %s6108_s28 = smov 111   ;;  %6068 = vset.pattern.permute.xlu0 %v6109_v5  ;;  %v75_v13 = vld [vmem:[%s7339_s6] ss:$8 sm:$0xf]  ;;  %vm4432_vm11 = vcmask 130048  }
   0x4   :  { %66 = vrot.lane.b32.xlu1 %v6212_v3, %s6101_s22  ;;  %v6285_v10 = vsub.s32 1, %v78_v8  ;;  %v6287_v11 = vsub.s32 0, %v78_v8  ;;  %v6292_v14 = vsub.s32 2, %v78_v8  ;;  %v6294_v15 = vsub.s32 3, %v78_v8  ;;  %v101_v29 = vld [vmem:[%s7340_s1] sm:$0xff] }
   0x5   :  { %vm70_vm0 = vcmp.lt.s32.totalorder %v6283_v9, 17  ;;  %v5372_v34 = vld [vmem:[%s7339_s6 + $0x1] ss:$8 sm:$0xf]  ;;  %vm422_vm3 = vcmp.lt.s32.totalorder %v6283_v9, 16  ;;  %vm625_vm4 = vcmp.lt.s32.totalorder %v6283_v9, 15 }
   0x6   :  { %62 = vrot.lane.b32.xlu0 %v6216_v4, %s6101_s22  ;;  %v6298_v17 = vrot.slane %v75_v13, %v6285_v10  ;;  %v6301_v18 = vrot.slane %v75_v13, %v6287_v11  ;;  %v6306_v21 = vrot.slane %v75_v13, %v6292_v14  ;;  %v6309_v22 = vrot.slane %v75_v13, %v6294_v15  ;;  %v5359_v39 = vld [vmem:[%s7340_s1 + $0x20] sm:$0xff] }
   0x7   :  { %v6337_v36 = vrot.slane %v5372_v34, %v6285_v10  ;;  %v6351_v41 = vrot.slane %v5372_v34, %v6287_v11  ;;  %v6357_v44 = vrot.slane %v5372_v34, %v6294_v15  ;;  %v5380_v47 = vld [vmem:[%s7339_s6 + $0x2] ss:$8 sm:$0xf]  ;;  %v6372_v50 = vrot.slane %v5372_v34, %v6292_v14  ;;  %v5388_v51 = vld [vmem:[%s7339_s6 + $0x3] ss:$8 sm:$0xf] }
   0x8   :  { %64 = vrot.lane.b32.xlu1 %v6204_v1, %s6101_s22  ;;  %v6381_v54 = vrot.slane %v5380_v47, %v6285_v10  ;;  %vm828_vm5 = vcmp.lt.s32.totalorder %v6283_v9, 1  ;;  %v6394_v59 = vrot.slane %v5388_v51, %v6285_v10  ;;  %v6398_v61 = vrot.slane %v5380_v47, %v6287_v11 }
   0x9   :  { %v6418_v7 = vrot.slane %v5388_v51, %v6294_v15  ;;  %v6423_v13 = vrot.slane %v5380_v47, %v6292_v14  ;;  %vm1031_vm6 = vcmp.lt.s32.totalorder %v6283_v9, 127  ;;  %vm1234_vm7 = vcmp.lt.s32.totalorder %v6283_v9, 113 }
   0xa   :  { %414 = vrot.lane.b32.xlu0 %v6199_v0, %s6102_s0  ;;  %vm1437_vm8 = vcmp.lt.s32.totalorder %v6283_v9, 112  ;;  %vm1640_vm9 = vcmp.lt.s32.totalorder %v6283_v9, 111  ;;  %vm5352_vm12 = vcmask 261120  }
   0xc   :  { %416 = vrot.lane.b32.xlu1 %v6216_v4, %s6102_s0 }
   0xe   :  { %420 = vrot.lane.b32.xlu0 %v6212_v3, %s6102_s0 }
  0x10   :  { %418 = vrot.lane.b32.xlu1 %v6204_v1, %s6102_s0 }
  0x12   :  { %617 = vrot.lane.b32.xlu0 %v6199_v0, %s6103_s23 }
  0x14   :  { %619 = vrot.lane.b32.xlu1 %v6216_v4, %s6103_s23 }
  0x16   :  { %623 = vrot.lane.b32.xlu0 %v6212_v3, %s6103_s23 }
  0x18   :  { %621 = vrot.lane.b32.xlu1 %v6204_v1, %s6103_s23 }
  0x1a   :  { %820 = vrot.lane.b32.xlu0 %v6199_v0, %s6104_s24 }
  0x1c   :  { %822 = vrot.lane.b32.xlu1 %v6216_v4, %s6104_s24 }
  0x1e   :  { %826 = vrot.lane.b32.xlu0 %v6212_v3, %s6104_s24 }
  0x20   :  { %824 = vrot.lane.b32.xlu1 %v6204_v1, %s6104_s24 }
  0x22   :  { %1025 = vrot.lane.b32.xlu0 %v6216_v4, %s6105_s25 }
  0x24   :  { %1027 = vrot.lane.b32.xlu1 %v6204_v1, %s6105_s25 }
  0x26   :  { %1023 = vrot.lane.b32.xlu0 %v6199_v0, %s6105_s25 }
  0x28   :  { %1029 = vrot.lane.b32.xlu1 %v6212_v3, %s6105_s25 }
  0x2a   :  { %1228 = vrot.lane.b32.xlu0 %v6216_v4, %s6106_s26 }
  0x2c   :  { %1230 = vrot.lane.b32.xlu1 %v6204_v1, %s6106_s26 }
  0x2e   :  { %1226 = vrot.lane.b32.xlu0 %v6199_v0, %s6106_s26 }
  0x30   :  { %1232 = vrot.lane.b32.xlu1 %v6212_v3, %s6106_s26 }
  0x32   :  { %1431 = vrot.lane.b32.xlu0 %v6216_v4, %s6107_s27 }
  0x34   :  { %1433 = vrot.lane.b32.xlu1 %v6204_v1, %s6107_s27 }
  0x36   :  { %1429 = vrot.lane.b32.xlu0 %v6199_v0, %s6107_s27 }
  0x38   :  { %1435 = vrot.lane.b32.xlu1 %v6212_v3, %s6107_s27 }
  0x3a   :  { %1634 = vrot.lane.b32.xlu0 %v6216_v4, %s6108_s28 }
  0x3c   :  { %1636 = vrot.lane.b32.xlu1 %v6204_v1, %s6108_s28 }
  0x3e   :  { %1632 = vrot.lane.b32.xlu0 %v6199_v0, %s6108_s28 }
  0x40   :  { %1638 = vrot.lane.b32.xlu1 %v6212_v3, %s6108_s28 }
  0x42   :  { %1838 = vperm.xlu0 %6068, %v1835_v6  }
  0x74   :  { %v61_v12 = vpop.permute.xlu0 %60 }
  0x76   :  { %v67_v16 = vpop.permute.xlu1 %66 }
  0x77   :  { %v74_v19 = vsel %vm70_vm0, %v67_v16, %v61_v12 }
  0x78   :  { %v63_v20 = vpop.permute.xlu0 %62  ;;  %v97_v26 = vmul.f32 %v6301_v18, %v74_v19  ;;  %v5396_v19 = vld [vmem:[%s7339_s6 + $0x5] ss:$8 sm:$0xf] }
  0x79   :  { %v73_v23 = vsel %vm70_vm0, %v61_v12, %v63_v20 }
  0x7a   :  { %v65_v24 = vpop.permute.xlu1 %64  ;;  %v98_v25 = vmul.f32 %v6298_v17, %v73_v23 }
  0x7b   :  { %v71_v27 = vsel %vm70_vm0, %v65_v24, %v67_v16  ;;  %v72_v28 = vsel %vm70_vm0, %v63_v20, %v65_v24 }
  0x7c   :  { %v99_v30 = vmul.f32 %v6306_v21, %v72_v28  ;;  %v100_v31 = vmul.f32 %v6309_v22, %v71_v27  ;;  %5360 = vmatprep.subr.msk.mxu1 %vm106_vm1, %v98_v25  ;;  %v415_v32 = vpop.permute.xlu0 %414  ;;  %v5381_v28 = vld [vmem:[%s7340_s1 + $0x10] sm:$0xff] }
  0x7d   :  { %5361 = vmatpush1.msk.msra.mxu1 %vm106_vm1, %v97_v26  ;;  %v5389_v26 = vld [vmem:[%s7340_s1 + $0x18] sm:$0xff] }
  0x7e   :  { %v417_v33 = vpop.permute.xlu1 %416  ;;  %5362 = vmatmul.mubr.msk.f32.vlgmr.msra.gmra.mrb[0].mxu1 %vm102_vm2, %v101_v29  ;;  %5363 = vmatprep.subr.msk.mxu1 %vm106_vm1, %v100_v31  ;;  %v6451_v31 = vrot.slane %v5396_v19, %v6285_v10 }
  0x7f   :  { %5364 = vmatpush1.msk.msra.mxu1 %vm106_vm1, %v99_v30  ;;  %254 = vmatprep.mubr.f32.mxu1 %v6100_v2  ;;  %v425_v38 = vsel %vm422_vm3, %v415_v32, %v417_v33 }
  0x80   :  { %v421_v35 = vpop.permute.xlu0 %420  ;;  %5366 = vmatprep.subr.msk.mxu1 %vm106_vm1, %v6216_v4  ;;  %v451_v42 = vmul.f32 %v6337_v36, %v425_v38 }
  0x81   :  { %v426_v43 = vsel %vm422_vm3, %v421_v35, %v415_v32 }
  0x82   :  { %v419_v37 = vpop.permute.xlu1 %418  ;;  %5365 = vmatmul.mubr.msk.f32.vlgmr.msra.gmra.mrb[2].mxu1 %vm102_vm2, %v101_v29  ;;  %v450_v49 = vmul.f32 %v6351_v41, %v426_v43 }
  0x83   :  { %5367 = vmatpush1.msk.msra.mxu1 %vm106_vm1, %v6199_v0  ;;  %336 = vmatprep.mubr.f32.mxu1 %v6100_v2  ;;  %v423_v46 = vsel %vm422_vm3, %v419_v37, %v421_v35  ;;  %v424_v52 = vsel %vm422_vm3, %v417_v33, %v419_v37  ;;  %v6404_v0 = vrot.slane %v5380_v47, %v6294_v15 }
  0x84   :  { %v618_v40 = vpop.permute.xlu0 %617  ;;  %5369 = vmatprep.subr.msk.mxu1 %vm106_vm1, %v6212_v3  ;;  %v453_v53 = vmul.f32 %v6357_v44, %v423_v46  ;;  %v452_v60 = vmul.f32 %v6372_v50, %v424_v52  ;;  %v6408_v3 = vrot.slane %v5388_v51, %v6287_v11  ;;  %v6455_v33 = vrot.slane %v5388_v51, %v6292_v14  ;;  %v5404_v46 = vld [vmem:[%s7339_s6 + $0x6] ss:$8 sm:$0xf] }
  0x85   :  { %v6462_v37 = vrot.slane %v5396_v19, %v6287_v11 }
  0x86   :  { %v620_v45 = vpop.permute.xlu1 %619  ;;  %5368 = vmatmul.mubr.msk.f32.vlgmr.msra.gmra.mrb[0].mxu1 %vm102_vm2, %v5359_v39 }
  0x87   :  { %5370 = vmatpush1.msk.msra.mxu1 %vm106_vm1, %v6204_v1  ;;  %407 = vmatprep.mubr.f32.mxu1 %v6100_v2  ;;  %v628_v56 = vsel %vm625_vm4, %v618_v40, %v620_v45 }
  0x88   :  { %5374 = vmatprep.subr.msk.mxu1 %vm106_vm1, %v451_v42  ;;  %v624_v48 = vpop.permute.xlu0 %623  ;;  %v654_v62 = vmul.f32 %v6381_v54, %v628_v56  ;;  %v6472_v42 = vrot.slane %v5396_v19, %v6294_v15  ;;  %v6497_v56 = vrot.slane %v5396_v19, %v6292_v14  ;;  %v5405_v19 = vld [vmem:[%s7340_s1 + $0x30] sm:$0xff] }
  0x89   :  { %v629_v63 = vsel %vm625_vm4, %v624_v48, %v618_v40 }
  0x8a   :  { %v622_v55 = vpop.permute.xlu1 %621  ;;  %5371 = vmatmul.mubr.msk.f32.vlgmr.msra.gmra.mrb[2].mxu1 %vm102_vm2, %v5359_v39  ;;  %v653_v12 = vmul.f32 %v6398_v61, %v629_v63 }
  0x8b   :  { %5375 = vmatpush1.msk.msra.mxu1 %vm106_vm1, %v450_v49  ;;  %535 = vmatprep.mubr.f32.mxu1 %v6100_v2  ;;  %v626_v4 = vsel %vm625_vm4, %v622_v55, %v624_v48  ;;  %v627_v20 = vsel %vm625_vm4, %v620_v45, %v622_v55  ;;  %v5397_v49 = vld [vmem:[%s7340_s1 + $0x28] sm:$0xff]  ;;  %v6494_v55 = vrot.slane %v5404_v46, %v6285_v10 }
  0x8c   :  { %5377 = vmatprep.subr.msk.mxu1 %vm106_vm1, %v453_v53  ;;  %v821_v58 = vpop.permute.xlu0 %820  ;;  %v656_v23 = vmul.f32 %v6404_v0, %v626_v4  ;;  %v655_v32 = vmul.f32 %v6423_v13, %v627_v20  ;;  %v6511_v4 = vrot.slane %v5404_v46, %v6294_v15 }
  0x8e   :  { %v823_v1 = vpop.permute.xlu1 %822  ;;  %5376 = vmatmul.mubr.msk.f32.vlgmr.msra.gmra.mrb[0].mxu1 %vm102_vm2, %v5373_v57 }
  0x8f   :  { %v831_v5 = vsel %vm828_vm5, %v821_v58, %v823_v1  ;;  %5378 = vmatpush1.msk.msra.mxu1 %vm106_vm1, %v452_v60  ;;  %606 = vmatprep.mubr.f32.mxu1 %v6100_v2  ;;  %v6504_v60 = vrot.slane %v5404_v46, %v6287_v11 }
  0x90   :  { %5382 = vmatprep.subr.msk.mxu1 %vm106_vm1, %v654_v62  ;;  %v827_v6 = vpop.permute.xlu0 %826  ;;  %v857_v8 = vmul.f32 %v6394_v59, %v831_v5 }
  0x91   :  { %v832_v16 = vsel %vm828_vm5, %v827_v6, %v821_v58 }
  0x92   :  { %v856_v24 = vmul.f32 %v6408_v3, %v832_v16  ;;  %v825_v25 = vpop.permute.xlu1 %824  ;;  %5379 = vmatmul.mubr.msk.f32.vlgmr.msra.gmra.mrb[2].mxu1 %vm102_vm2, %v5373_v57  ;;  %5390 = vmatprep.subr.msk.mxu0 %vm106_vm1, %v857_v8  ;;  %v5412_v8 = vld [vmem:[%s7339_s6 + $0x7] ss:$8 sm:$0xf] }
  0x93   :  { %v829_v27 = vsel %vm828_vm5, %v825_v25, %v827_v6  ;;  %5383 = vmatpush1.msk.msra.mxu1 %vm106_vm1, %v653_v12  ;;  %738 = vmatprep.mubr.f32.mxu1 %v6100_v2  ;;  %v830_v34 = vsel %vm828_vm5, %v823_v1, %v825_v25  ;;  %v6533_v25 = vrot.slane %v5412_v8, %v6285_v10 }
  0x94   :  { %v859_v29 = vmul.f32 %v6418_v7, %v829_v27  ;;  %5385 = vmatprep.subr.msk.mxu1 %vm106_vm1, %v656_v23  ;;  %5391 = vmatpush1.msk.msra.mxu0 %vm106_vm1, %v856_v24  ;;  %v1026_v30 = vpop.permute.xlu0 %1025  ;;  %v858_v43 = vmul.f32 %v6455_v33, %v830_v34 }
  0x95   :  { %5392 = vmatmul.mubr.msk.f32.vlgmr.msra.gmra.mrb[0].mxu0 %vm102_vm2, %v5389_v26 }
  0x96   :  { %v1028_v35 = vpop.permute.xlu1 %1027  ;;  %5384 = vmatmul.mubr.msk.f32.vlgmr.msra.gmra.mrb[0].mxu1 %vm102_vm2, %v5381_v28  ;;  %1144 = vmatprep.mubr.f32.mxu0 %v6100_v2 }
  0x97   :  { %v1033_v38 = vsel %vm1031_vm6, %v1026_v30, %v1028_v35  ;;  %5386 = vmatpush1.msk.msra.mxu1 %vm106_vm1, %v655_v32  ;;  %809 = vmatprep.mubr.f32.mxu1 %v6100_v2 }
  0x98   :  { %v1060_v39 = vmul.f32 %v6451_v31, %v1033_v38  ;;  %5393 = vmatprep.subr.msk.mxu1 %vm106_vm1, %v859_v29  ;;  %v1024_v40 = vpop.permute.xlu0 %1023  ;;  %v6543_v29 = vrot.slane %v5412_v8, %v6287_v11 }
  0x99   :  { %v1034_v45 = vsel %vm1031_vm6, %v1024_v40, %v1026_v30 }
  0x9a   :  { %v1059_v47 = vmul.f32 %v6462_v37, %v1034_v45  ;;  %v1030_v48 = vpop.permute.xlu1 %1029  ;;  %5387 = vmatmul.mubr.msk.f32.vlgmr.msra.gmra.mrb[2].mxu1 %vm102_vm2, %v5381_v28  ;;  %5398 = vmatprep.subr.msk.mxu0 %vm106_vm1, %v1060_v39 }
  0x9b   :  { %v1035_v51 = vsel %vm1031_vm6, %v1030_v48, %v1024_v40  ;;  %5394 = vmatpush1.msk.msra.mxu1 %vm106_vm1, %v858_v43  ;;  %1012 = vmatprep.mubr.f32.mxu1 %v6100_v2  ;;  %v1032_v57 = vsel %vm1031_vm6, %v1028_v35, %v1030_v48  ;;  %v6550_v35 = vrot.slane %v5412_v8, %v6294_v15  ;;  %v5420_v40 = vld [vmem:[%s7339_s6 + $0x20] ss:$8 sm:$0xf] }
  0x9c   :  { %v1062_v52 = vmul.f32 %v6472_v42, %v1035_v51  ;;  %5399 = vmatpush1.msk.msra.mxu0 %vm106_vm1, %v1059_v47  ;;  %v1229_v53 = vpop.permute.xlu0 %1228  ;;  %v1061_v5 = vmul.f32 %v6497_v56, %v1032_v57 }
  0x9d   :  { %5400 = vmatmul.mubr.msk.f32.vlgmr.msra.gmra.mrb[0].mxu0 %vm102_vm2, %v5397_v49 }
  0x9e   :  { %v1231_v58 = vpop.permute.xlu1 %1230  ;;  %5401 = vmatprep.subr.msk.mxu1 %vm106_vm1, %v1062_v52  ;;  %1347 = vmatprep.mubr.f32.mxu0 %v6100_v2  ;;  %v6575_v52 = vrot.slane %v5412_v8, %v6292_v14 }
  0x9f   :  { %v1236_v62 = vsel %vm1234_vm7, %v1229_v53, %v1231_v58 }
  0xa0   :  { %v1263_v63 = vmul.f32 %v6494_v55, %v1236_v62  ;;  %v1227_v1 = vpop.permute.xlu0 %1226 }
  0xa1   :  { %v1237_v6 = vsel %vm1234_vm7, %v1227_v1, %v1229_v53 }
  0xa2   :  { %v1262_v12 = vmul.f32 %v6504_v60, %v1237_v6  ;;  %v1233_v16 = vpop.permute.xlu1 %1232  ;;  %5395 = vmatmul.mubr.msk.f32.vlgmr.msra.gmra.mrb[2].mxu1 %vm102_vm2, %v5389_v26  ;;  %5406 = vmatprep.subr.msk.mxu0 %vm106_vm1, %v1263_v63  ;;  %v6536_v26 = vrot.slane %v5404_v46, %v6292_v14  ;;  %v5413_v46 = vld [vmem:[%s7340_s1 + $0x38] sm:$0xff] }
  0xa3   :  { %v1238_v20 = vsel %vm1234_vm7, %v1233_v16, %v1227_v1  ;;  %5402 = vmatpush1.msk.msra.mxu1 %vm106_vm1, %v1061_v5  ;;  %1215 = vmatprep.mubr.f32.mxu1 %v6100_v2  ;;  %v1235_v27 = vsel %vm1234_vm7, %v1231_v58, %v1233_v16  ;;  %v6582_v58 = vrot.slane %v5420_v40, %v6287_v11 }
  0xa4   :  { %v1265_v23 = vmul.f32 %v6511_v4, %v1238_v20  ;;  %5407 = vmatpush1.msk.msra.mxu0 %vm106_vm1, %v1262_v12  ;;  %v1432_v24 = vpop.permute.xlu0 %1431  ;;  %v1264_v38 = vmul.f32 %v6536_v26, %v1235_v27  ;;  %v6589_v5 = vrot.slane %v5420_v40, %v6294_v15  ;;  %v5421_v20 = vld [vmem:[%s7340_s1 + $0x40] sm:$0xff]  ;;  %v6607_v27 = vrot.slane %v5420_v40, %v6292_v14  ;;  %s6110_s1 = smov 8  }
  0xa5   :  { %5408 = vmatmul.mubr.msk.f32.vlgmr.msra.gmra.mrb[0].mxu0 %vm102_vm2, %v5405_v19 }
  0xa6   :  { %v1434_v28 = vpop.permute.xlu1 %1433  ;;  %5409 = vmatprep.subr.msk.mxu1 %vm106_vm1, %v1265_v23  ;;  %1550 = vmatprep.mubr.f32.mxu0 %v6100_v2 }
  0xa7   :  { %v1439_v30 = vsel %vm1437_vm8, %v1432_v24, %v1434_v28 }
  0xa8   :  { %v1466_v32 = vmul.f32 %v6533_v25, %v1439_v30  ;;  %v1430_v34 = vpop.permute.xlu0 %1429 }
  0xa9   :  { %v1440_v39 = vsel %vm1437_vm8, %v1430_v34, %v1432_v24 }
  0xaa   :  { %v1465_v43 = vmul.f32 %v6543_v29, %v1440_v39  ;;  %v1436_v45 = vpop.permute.xlu1 %1435  ;;  %5403 = vmatmul.mubr.msk.f32.vlgmr.msra.gmra.mrb[2].mxu1 %vm102_vm2, %v5397_v49  ;;  %5414 = vmatprep.subr.msk.mxu0 %vm106_vm1, %v1466_v32  ;;  %v6572_v49 = vrot.slane %v5420_v40, %v6285_v10 }
  0xab   :  { %v1441_v47 = vsel %vm1437_vm8, %v1436_v45, %v1430_v34  ;;  %5410 = vmatpush1.msk.msra.mxu1 %vm106_vm1, %v1264_v38  ;;  %1418 = vmatprep.mubr.f32.mxu1 %v6100_v2  ;;  %v1438_v53 = vsel %vm1437_vm8, %v1434_v28, %v1436_v45 }
  0xac   :  { %v1468_v48 = vmul.f32 %v6550_v35, %v1441_v47  ;;  %5415 = vmatpush1.msk.msra.mxu0 %vm106_vm1, %v1465_v43  ;;  %v1635_v51 = vpop.permute.xlu0 %1634  ;;  %v1467_v6 = vmul.f32 %v6575_v52, %v1438_v53 }
  0xad   :  { %5416 = vmatmul.mubr.msk.f32.vlgmr.msra.gmra.mrb[0].mxu0 %vm102_vm2, %v5413_v46 }
  0xae   :  { %v1637_v57 = vpop.permute.xlu1 %1636  ;;  %5417 = vmatprep.subr.msk.mxu1 %vm106_vm1, %v1468_v48  ;;  %1753 = vmatprep.mubr.f32.mxu0 %v6100_v2 }
  0xaf   :  { %v1642_v62 = vsel %vm1640_vm9, %v1635_v51, %v1637_v57 }
  0xb0   :  { %v1669_v63 = vmul.f32 %v6572_v49, %v1642_v62  ;;  %v1633_v1 = vpop.permute.xlu0 %1632 }
  0xb1   :  { %v1643_v8 = vsel %vm1640_vm9, %v1633_v1, %v1635_v51 }
  0xb2   :  { %v1668_v12 = vmul.f32 %v6582_v58, %v1643_v8  ;;  %v1639_v16 = vpop.permute.xlu1 %1638  ;;  %5411 = vmatmul.mubr.msk.f32.vlgmr.msra.gmra.mrb[2].mxu1 %vm102_vm2, %v5405_v19  ;;  %5422 = vmatprep.subr.msk.mxu0 %vm106_vm1, %v1669_v63 }
  0xb3   :  { %v1644_v23 = vsel %vm1640_vm9, %v1639_v16, %v1633_v1  ;;  %5418 = vmatpush1.msk.msra.mxu1 %vm106_vm1, %v1467_v6  ;;  %1621 = vmatprep.mubr.f32.mxu1 %v6100_v2  ;;  %v1641_v19 = vsel %vm1640_vm9, %v1637_v57, %v1639_v16  ;;  %v3328_v6 = vld [vmem:[%s7341_s4] sm:$0xff]  ;;  %s6112_s4 = smov 7  }
  0xb4   :  { %v1671_v24 = vmul.f32 %v6589_v5, %v1644_v23  ;;  %5423 = vmatpush1.msk.msra.mxu0 %vm106_vm1, %v1668_v12  ;;  %v1670_v28 = vmul.f32 %v6607_v27, %v1641_v19 }
  0xb5   :  { %5424 = vmatmul.mubr.msk.f32.vlgmr.msra.gmra.mrb[0].mxu0 %vm102_vm2, %v5421_v20 }
  0xb6   :  { %5425 = vmatprep.subr.msk.mxu1 %vm106_vm1, %v1671_v24  ;;  %1936 = vmatprep.mubr.f32.mxu0 %v6100_v2 }
  0xba   :  { %5419 = vmatmul.mubr.msk.f32.vlgmr.msra.gmra.mrb[2].mxu1 %vm102_vm2, %v5413_v46 }
  0xbb   :  { %5426 = vmatpush1.msk.msra.mxu1 %vm106_vm1, %v1670_v28  ;;  %1824 = vmatprep.mubr.f32.mxu1 %v6100_v2 }
  0xc1   :  { %v1839_v38 = vpop.permute.xlu0 %1838 }
  0xc2   :  { %5427 = vmatmul.mubr.msk.f32.vlgmr.msra.gmra.mrb[2].mxu1 %vm102_vm2, %v5421_v20 }
  0xc3   :  { %2007 = vmatprep.mubr.f32.mxu1 %v6100_v2 }
 0x169   :  { %v740_v30 = vpop.f32.mrb[0].mxu1 }
 0x16a   :  { %v742_v32 = vpop.f32.mrb[1].mxu1 }
 0x188   :  { %v1755_v34 = vpop.f32.mrb[0].mxu0 }
 0x189   :  { %v5956_v39 = vadd.f32 %v1755_v34, %v740_v30  ;;  %v1757_v40 = vpop.f32.mrb[1].mxu0 }
 0x18a   :  { %v5957_v43 = vadd.f32 %v1757_v40, %v742_v32 }
 0x18b   :  { %v1841_v45 = vadd.f32 %v5956_v39, %v1839_v38 }
 0x18c   :  { %v1842_v47 = vadd.f32 %v5957_v43, %v1839_v38 }
 0x18d   :  { %6072 = vtanh.f32 %v1841_v45 }
 0x18e   :  { %6074 = vtanh.f32 %v1842_v47 }
 0x195   :  { %v1826_v46 = vpop.f32.mrb[2].mxu1 }
 0x196   :  { %v1843_v48 = vadd.f32 %v1839_v38, %v1826_v46  ;;  %v1828_v51 = vpop.f32.mrb[3].mxu1 }
 0x197   :  { %v6620_v53 = vpop.eup %6072  ;;  %v1844_v57 = vadd.f32 %v1839_v38, %v1828_v51  ;;  %v5428_v51 = vld [vmem:[%s7342_s3 + $0x20] sm:$0xff] }
 0x198   :  { %6076 = vtanh.f32 %v1843_v48  ;;  %1851 = vrot.lane.b32.xlu1 %v6620_v53, %s6101_s22  ;;  %v6075_v62 = vpop.eup %6074 }
 0x199   :  { %6078 = vtanh.f32 %v1844_v57 }
 0x19c   :  { %1853 = vrot.lane.b32.xlu1 %v6075_v62, %s6101_s22 }
 0x1a2   :  { %v6625_v63 = vpop.eup %6076 }
 0x1a3   :  { %v6079_v1 = vpop.eup %6078  ;;  %1855 = vrot.lane.b32.xlu0 %v6625_v63, %s6101_s22 }
 0x1a4   :  { %1857 = vrot.lane.b32.xlu1 %v6079_v1, %s6101_s22  ;;  %s6111_s22 = smov 9  }
 0x1a7   :  { %2159 = vrot.lane.b32.xlu0 %v6620_v53, %s6102_s0 }
 0x1a8   :  { %2161 = vrot.lane.b32.xlu1 %v6075_v62, %s6102_s0 }
 0x1ab   :  { %2163 = vrot.lane.b32.xlu0 %v6625_v63, %s6102_s0 }
 0x1ac   :  { %2165 = vrot.lane.b32.xlu1 %v6079_v1, %s6102_s0  ;;  %s6113_s0 = smov 121  }
 0x1af   :  { %2326 = vrot.lane.b32.xlu0 %v6620_v53, %s6103_s23 }
 0x1b0   :  { %2328 = vrot.lane.b32.xlu1 %v6075_v62, %s6103_s23 }
 0x1b3   :  { %2330 = vrot.lane.b32.xlu0 %v6625_v63, %s6103_s23 }
 0x1b4   :  { %2332 = vrot.lane.b32.xlu1 %v6079_v1, %s6103_s23  ;;  %s6114_s23 = smov 119  }
 0x1b7   :  { %2493 = vrot.lane.b32.xlu0 %v6620_v53, %s6104_s24 }
 0x1b8   :  { %2495 = vrot.lane.b32.xlu1 %v6075_v62, %s6104_s24 }
 0x1bb   :  { %2497 = vrot.lane.b32.xlu0 %v6625_v63, %s6104_s24 }
 0x1bc   :  { %2499 = vrot.lane.b32.xlu1 %v6079_v1, %s6104_s24 }
 0x1bf   :  { %2660 = vrot.lane.b32.xlu0 %v6620_v53, %s6105_s25 }
 0x1c0   :  { %2662 = vrot.lane.b32.xlu1 %v6075_v62, %s6105_s25 }
 0x1c3   :  { %2664 = vrot.lane.b32.xlu0 %v6625_v63, %s6105_s25 }
 0x1c4   :  { %2666 = vrot.lane.b32.xlu1 %v6079_v1, %s6105_s25 }
 0x1c7   :  { %2827 = vrot.lane.b32.xlu0 %v6620_v53, %s6106_s26 }
 0x1c8   :  { %2829 = vrot.lane.b32.xlu1 %v6075_v62, %s6106_s26 }
 0x1cb   :  { %2831 = vrot.lane.b32.xlu0 %v6625_v63, %s6106_s26 }
 0x1cc   :  { %2833 = vrot.lane.b32.xlu1 %v6079_v1, %s6106_s26  ;;  %s6115_s26 = smov 120  }
 0x1cf   :  { %2994 = vrot.lane.b32.xlu0 %v6620_v53, %s6107_s27 }
 0x1d0   :  { %2996 = vrot.lane.b32.xlu1 %v6075_v62, %s6107_s27 }
 0x1d3   :  { %2998 = vrot.lane.b32.xlu0 %v6625_v63, %s6107_s27 }
 0x1d4   :  { %3000 = vrot.lane.b32.xlu1 %v6079_v1, %s6107_s27 }
 0x1d7   :  { %3161 = vrot.lane.b32.xlu0 %v6620_v53, %s6108_s28 }
 0x1d8   :  { %3163 = vrot.lane.b32.xlu1 %v6075_v62, %s6108_s28 }
 0x1db   :  { %3165 = vrot.lane.b32.xlu0 %v6625_v63, %s6108_s28 }
 0x1dc   :  { %3167 = vrot.lane.b32.xlu1 %v6079_v1, %s6108_s28 }
 0x1df   :  { %3331 = vperm.xlu0 %6068, %v3328_v6  }
 0x20a   :  { %v1852_v8 = vpop.permute.xlu1 %1851 }
 0x20e   :  { %v1854_v12 = vpop.permute.xlu1 %1853 }
 0x20f   :  { %v1861_v16 = vsel %vm70_vm0, %v1852_v8, %v1854_v12 }
 0x210   :  { %v1864_v20 = vmul.f32 %v1861_v16, %v6298_v17  ;;  %v1867_v17 = vld [vmem:[%s7342_s3] sm:$0xff]  ;;  %v5433_v16 = vld [vmem:[%s7342_s3 + $0x8] sm:$0xff] }
 0x212   :  { %1872 = vmatprep.subr.mxu0 %v1864_v20 }
 0x215   :  { %v1856_v23 = vpop.permute.xlu0 %1855 }
 0x216   :  { %v1860_v24 = vsel %vm70_vm0, %v1854_v12, %v1856_v23  ;;  %v1858_v19 = vpop.permute.xlu1 %1857 }
 0x217   :  { %v1859_v28 = vsel %vm70_vm0, %v1856_v23, %v1858_v19  ;;  %v1862_v30 = vsel %vm70_vm0, %v1858_v19, %v1852_v8  ;;  %v1865_v38 = vmul.f32 %v1860_v24, %v6306_v21 }
 0x218   :  { %v1863_v32 = vmul.f32 %v1862_v30, %v6301_v18  ;;  %v1866_v34 = vmul.f32 %v1859_v28, %v6309_v22 }
 0x219   :  { %v2160_v39 = vpop.permute.xlu0 %2159 }
 0x21a   :  { %1873 = vmatpush1.msra.mxu0 %v1863_v32  ;;  %v2162_v40 = vpop.permute.xlu1 %2161  ;;  %1943 = vmatprep.subr.mxu1 %v1866_v34 }
 0x21b   :  { %v2169_v43 = vsel %vm422_vm3, %v2160_v39, %v2162_v40  ;;  %5429 = vmatmul.mubr.msk.f32.vlgmr.msra.gmra.mrb[2].mxu0 %vm1868_vm10, %v1867_v17  ;;  %1944 = vmatpush1.msra.mxu1 %v1865_v38 }
 0x21c   :  { %v2172_v18 = vmul.f32 %v2169_v43, %v6337_v36  ;;  %2017 = vmatprep.subr.mxu0 %v6075_v62  ;;  %5430 = vmatmul.mubr.msk.f32.vlgmr.msra.gmra.mrb[4].mxu1 %vm1868_vm10, %v1867_v17  ;;  %v5436_v17 = vld [vmem:[%s7342_s3 + $0x10] sm:$0xff] }
 0x21d   :  { %2018 = vmatpush1.msra.mxu0 %v6620_v53  ;;  %2088 = vmatprep.subr.mxu1 %v6079_v1  ;;  %v2164_v22 = vpop.permute.xlu0 %2163 }
 0x21e   :  { %2089 = vmatpush1.msra.mxu1 %v6625_v63  ;;  %v2166_v21 = vpop.permute.xlu1 %2165  ;;  %2180 = vmatprep.subr.mxu0 %v2172_v18  ;;  %v2168_v36 = vsel %vm422_vm3, %v2162_v40, %v2164_v22 }
 0x21f   :  { %v2167_v45 = vsel %vm422_vm3, %v2164_v22, %v2166_v21  ;;  %v2170_v47 = vsel %vm422_vm3, %v2166_v21, %v2160_v39  ;;  %2081 = vmatprep.mubr.f32.mxu0 %v6100_v2  ;;  %2152 = vmatprep.mubr.f32.mxu1 %v6100_v2  ;;  %v2173_v62 = vmul.f32 %v2168_v36, %v6372_v50 }
 0x220   :  { %v2171_v46 = vmul.f32 %v2170_v47, %v6351_v41  ;;  %v2174_v48 = vmul.f32 %v2167_v45, %v6357_v44  ;;  %v5439_v47 = vld [vmem:[%s7342_s3 + $0x18] sm:$0xff] }
 0x221   :  { %v2327_v53 = vpop.permute.xlu0 %2326 }
 0x222   :  { %v2329_v57 = vpop.permute.xlu1 %2328  ;;  %2251 = vmatprep.subr.mxu1 %v2174_v48 }
 0x223   :  { %v2336_v63 = vsel %vm625_vm4, %v2327_v53, %v2329_v57  ;;  %5431 = vmatmul.mubr.msk.f32.vlgmr.msra.gmra.mrb[2].mxu0 %vm1868_vm10, %v5428_v51 }
 0x224   :  { %v2339_v1 = vmul.f32 %v2336_v63, %v6381_v54  ;;  %2181 = vmatpush1.msra.mxu0 %v2171_v46  ;;  %5432 = vmatmul.mubr.msk.f32.vlgmr.msra.gmra.mrb[4].mxu1 %vm1868_vm10, %v5428_v51 }
 0x225   :  { %2252 = vmatpush1.msra.mxu1 %v2173_v62  ;;  %v2331_v41 = vpop.permute.xlu0 %2330  ;;  %2244 = vmatprep.mubr.f32.mxu0 %v6100_v2 }
 0x226   :  { %v2333_v44 = vpop.permute.xlu1 %2332  ;;  %2347 = vmatprep.subr.mxu0 %v2339_v1  ;;  %2315 = vmatprep.mubr.f32.mxu1 %v6100_v2  ;;  %v2335_v54 = vsel %vm625_vm4, %v2329_v57, %v2331_v41  ;;  %v5442_v1 = vld [vmem:[%s7342_s3 + $0x28] sm:$0xff] }
 0x227   :  { %v2334_v50 = vsel %vm625_vm4, %v2331_v41, %v2333_v44  ;;  %v2337_v6 = vsel %vm625_vm4, %v2333_v44, %v2327_v53  ;;  %v2340_v24 = vmul.f32 %v2335_v54, %v6423_v13 }
 0x228   :  { %v2338_v8 = vmul.f32 %v2337_v6, %v6398_v61  ;;  %v2341_v12 = vmul.f32 %v2334_v50, %v6404_v0 }
 0x229   :  { %v2494_v20 = vpop.permute.xlu0 %2493 }
 0x22a   :  { %v2496_v23 = vpop.permute.xlu1 %2495  ;;  %2418 = vmatprep.subr.mxu1 %v2341_v12 }
 0x22b   :  { %v2503_v19 = vsel %vm828_vm5, %v2494_v20, %v2496_v23  ;;  %5434 = vmatmul.mubr.msk.f32.vlgmr.msra.gmra.mrb[2].mxu0 %vm1868_vm10, %v5433_v16 }
 0x22c   :  { %v2506_v28 = vmul.f32 %v2503_v19, %v6394_v59  ;;  %2348 = vmatpush1.msra.mxu0 %v2338_v8  ;;  %5435 = vmatmul.mubr.msk.f32.vlgmr.msra.gmra.mrb[4].mxu1 %vm1868_vm10, %v5433_v16 }
 0x22d   :  { %2419 = vmatpush1.msra.mxu1 %v2340_v24  ;;  %v2498_v61 = vpop.permute.xlu0 %2497  ;;  %2411 = vmatprep.mubr.f32.mxu0 %v6100_v2 }
 0x22e   :  { %v2500_v0 = vpop.permute.xlu1 %2499  ;;  %2514 = vmatprep.subr.mxu0 %v2506_v28  ;;  %2482 = vmatprep.mubr.f32.mxu1 %v6100_v2  ;;  %v2502_v59 = vsel %vm828_vm5, %v2496_v23, %v2498_v61 }
 0x22f   :  { %v2501_v13 = vsel %vm828_vm5, %v2498_v61, %v2500_v0  ;;  %v2504_v30 = vsel %vm828_vm5, %v2500_v0, %v2494_v20  ;;  %v2507_v40 = vmul.f32 %v2502_v59, %v6455_v33  ;;  %v5445_v20 = vld [vmem:[%s7342_s3 + $0x30] sm:$0xff] }
 0x230   :  { %v2505_v32 = vmul.f32 %v2504_v30, %v6408_v3  ;;  %v2508_v34 = vmul.f32 %v2501_v13, %v6418_v7  ;;  %v3384_v13 = vld [vmem:[%s7343_s7 + $0x80] sm:$0xff]  ;;  %v3385_v30 = vld [vmem:[%s7343_s7 + $0x88] sm:$0xff] }
 0x231   :  { %v2661_v38 = vpop.permute.xlu0 %2660  ;;  %v5824_v9 = vpack.c.bf16 %v3385_v30, %v3384_v13  ;;  %v3424_v13 = vld [vmem:[%s7343_s7 + $0x1c0] sm:$0xff]  ;;  %v3425_v30 = vld [vmem:[%s7343_s7 + $0x1c8] sm:$0xff] }
 0x232   :  { %v2663_v39 = vpop.permute.xlu1 %2662  ;;  %2585 = vmatprep.subr.mxu1 %v2508_v34  ;;  %v3416_v34 = vld [vmem:[%s7343_s7 + $0x180] sm:$0xff] }
 0x233   :  { %5437 = vmatmul.mubr.msk.f32.vlgmr.msra.gmra.mrb[2].mxu0 %vm1868_vm10, %v5436_v17  ;;  %v2670_v18 = vsel %vm1031_vm6, %v2661_v38, %v2663_v39 }
 0x234   :  { %2515 = vmatpush1.msra.mxu0 %v2505_v32  ;;  %5438 = vmatmul.mubr.msk.f32.vlgmr.msra.gmra.mrb[4].mxu1 %vm1868_vm10, %v5436_v17  ;;  %v2672_v46 = vmul.f32 %v2670_v18, %v6462_v37  ;;  %v3417_v17 = vld [vmem:[%s7343_s7 + $0x188] sm:$0xff]  ;;  %v3418_v18 = vld [vmem:[%s7343_s7 + $0x190] sm:$0xff] }
 0x235   :  { %2586 = vmatpush1.msra.mxu1 %v2507_v40  ;;  %v2665_v43 = vpop.permute.xlu0 %2664  ;;  %2578 = vmatprep.mubr.f32.mxu0 %v6100_v2  ;;  %v3368_v40 = vld [vmem:[%s7343_s7] sm:$0xff] }
 0x236   :  { %v2669_v3 = vsel %vm1031_vm6, %v2663_v39, %v2665_v43  ;;  %v2667_v7 = vpop.permute.xlu1 %2666  ;;  %2649 = vmatprep.mubr.f32.mxu1 %v6100_v2 }
 0x237   :  { %v2673_v33 = vmul.f32 %v2669_v3, %v6451_v31  ;;  %v2671_v22 = vsel %vm1031_vm6, %v2667_v7, %v2661_v38  ;;  %v2668_v21 = vsel %vm1031_vm6, %v2665_v43, %v2667_v7  ;;  %v3401_v43 = vld [vmem:[%s7343_s7 + $0x108] sm:$0xff]  ;;  %v3386_v3 = vld [vmem:[%s7343_s7 + $0x90] sm:$0xff]  ;;  %v3387_v7 = vld [vmem:[%s7343_s7 + $0x98] sm:$0xff] }
 0x238   :  { %v2675_v45 = vmul.f32 %v2671_v22, %v6472_v42  ;;  %v2674_v31 = vmul.f32 %v2668_v21, %v6497_v56 }
 0x239   :  { %2681 = vmatprep.subr.mxu0 %v2673_v33  ;;  %v2828_v36 = vpop.permute.xlu0 %2827  ;;  %v5451_v33 = vld [vmem:[%s7342_s3 + $0x40] sm:$0xff] }
 0x23a   :  { %v2830_v48 = vpop.permute.xlu1 %2829  ;;  %2752 = vmatprep.subr.mxu1 %v2675_v45  ;;  %v5828_v45 = vpack.c.bf16 %v3387_v7, %v3386_v3  ;;  %v3411_v3 = vld [vmem:[%s7343_s7 + $0x158] sm:$0xff] }
 0x23b   :  { %5440 = vmatmul.mubr.msk.f32.vlgmr.msra.gmra.mrb[2].mxu0 %vm1868_vm10, %v5439_v47  ;;  %v2837_v37 = vsel %vm1234_vm7, %v2828_v36, %v2830_v48 }
 0x23c   :  { %2682 = vmatpush1.msra.mxu0 %v2672_v46  ;;  %5441 = vmatmul.mubr.msk.f32.vlgmr.msra.gmra.mrb[4].mxu1 %vm1868_vm10, %v5439_v47  ;;  %v2839_v44 = vmul.f32 %v2837_v37, %v6504_v60  ;;  %v3370_v47 = vld [vmem:[%s7343_s7 + $0x10] sm:$0xff]  ;;  %v3421_v37 = vld [vmem:[%s7343_s7 + $0x1a8] sm:$0xff] }
 0x23d   :  { %2753 = vmatpush1.msra.mxu1 %v2674_v31  ;;  %v2832_v51 = vpop.permute.xlu0 %2831  ;;  %2745 = vmatprep.mubr.f32.mxu0 %v6100_v2  ;;  %v3402_v46 = vld [vmem:[%s7343_s7 + $0x110] sm:$0xff]  ;;  %v3403_v31 = vld [vmem:[%s7343_s7 + $0x118] sm:$0xff] }
 0x23e   :  { %v2836_v42 = vsel %vm1234_vm7, %v2830_v48, %v2832_v51  ;;  %v2834_v53 = vpop.permute.xlu1 %2833  ;;  %2816 = vmatprep.mubr.f32.mxu1 %v6100_v2 }
 0x23f   :  { %v2840_v56 = vmul.f32 %v2836_v42, %v6494_v55  ;;  %v2838_v57 = vsel %vm1234_vm7, %v2834_v53, %v2828_v36  ;;  %v2835_v62 = vsel %vm1234_vm7, %v2832_v51, %v2834_v53  ;;  %v3371_v36 = vld [vmem:[%s7343_s7 + $0x18] sm:$0xff]  ;;  %v3388_v51 = vld [vmem:[%s7343_s7 + $0xa0] sm:$0xff]  ;;  %v3389_v42 = vld [vmem:[%s7343_s7 + $0xa8] sm:$0xff] }
 0x240   :  { %v2842_v63 = vmul.f32 %v2838_v57, %v6511_v4  ;;  %v2841_v55 = vmul.f32 %v2835_v62, %v6536_v26  ;;  %v3420_v53 = vld [vmem:[%s7343_s7 + $0x1a0] sm:$0xff]  ;;  %v5862_v57 = vpack.c.bf16 %v3403_v31, %v3402_v46  ;;  %v5832_v62 = vpack.c.bf16 %v3389_v42, %v3388_v51  ;;  %v3413_v51 = vld [vmem:[%s7343_s7 + $0x168] sm:$0xff]  ;;  %v3398_v42 = vld [vmem:[%s7343_s7 + $0xf0] sm:$0xff] }
 0x241   :  { %2848 = vmatprep.subr.mxu0 %v2840_v56  ;;  %v2995_v41 = vpop.permute.xlu0 %2994  ;;  %v5830_v56 = vpack.c.bf16 %v3371_v36, %v3370_v47  ;;  %v3428_v47 = vld [vmem:[%s7343_s7 + $0x1e0] sm:$0xff]  ;;  %v3429_v36 = vld [vmem:[%s7343_s7 + $0x1e8] sm:$0xff] }
 0x242   :  { %v2997_v50 = vpop.permute.xlu1 %2996  ;;  %2919 = vmatprep.subr.mxu1 %v2842_v63  ;;  %v3372_v63 = vld [vmem:[%s7343_s7 + $0x20] sm:$0xff] }
 0x243   :  { %5443 = vmatmul.mubr.msk.f32.vlgmr.msra.gmra.mrb[2].mxu0 %vm1868_vm10, %v5442_v1  ;;  %v3004_v60 = vsel %vm1437_vm8, %v2995_v41, %v2997_v50  ;;  %v3412_v31 = vld [vmem:[%s7343_s7 + $0x160] sm:$0xff] }
 0x244   :  { %2849 = vmatpush1.msra.mxu0 %v2839_v44  ;;  %5444 = vmatmul.mubr.msk.f32.vlgmr.msra.gmra.mrb[4].mxu1 %vm1868_vm10, %v5442_v1  ;;  %v3006_v24 = vmul.f32 %v3004_v60, %v6543_v29  ;;  %v3373_v1 = vld [vmem:[%s7343_s7 + $0x28] sm:$0xff]  ;;  %v5864_v44 = vpack.c.bf16 %v3421_v37, %v3420_v53  ;;  %v5882_v53 = vpack.c.bf16 %v3413_v51, %v3412_v31  ;;  %v3399_v37 = vld [vmem:[%s7343_s7 + $0xf8] sm:$0xff]  ;;  %v7102_v51 = vld [vmem:[%s7347_s13 + $0x5] ss:$0 sm:$0xff] }
 0x245   :  { %2920 = vmatpush1.msra.mxu1 %v2841_v55  ;;  %v2999_v6 = vpop.permute.xlu0 %2998  ;;  %2912 = vmatprep.mubr.f32.mxu0 %v6100_v2  ;;  %v3390_v55 = vld [vmem:[%s7343_s7 + $0xb0] sm:$0xff]  ;;  %v5834_v60 = vpack.c.bf16 %v3373_v1, %v3372_v63 }
 0x246   :  { %v3003_v4 = vsel %vm1437_vm8, %v2997_v50, %v2999_v6  ;;  %v3001_v54 = vpop.permute.xlu1 %3000  ;;  %2983 = vmatprep.mubr.f32.mxu1 %v6100_v2  ;;  %v3405_v50 = vld [vmem:[%s7343_s7 + $0x128] sm:$0xff]  ;;  %v3430_v1 = vld [vmem:[%s7343_s7 + $0x1f0] sm:$0xff] }
 0x247   :  { %v3007_v26 = vmul.f32 %v3003_v4, %v6533_v25  ;;  %v3005_v8 = vsel %vm1437_vm8, %v3001_v54, %v2995_v41  ;;  %v3002_v12 = vsel %vm1437_vm8, %v2999_v6, %v3001_v54  ;;  %v3404_v41 = vld [vmem:[%s7343_s7 + $0x120] sm:$0xff]  ;;  %v3391_v6 = vld [vmem:[%s7343_s7 + $0xb8] sm:$0xff]  ;;  %v3422_v4 = vld [vmem:[%s7343_s7 + $0x1b0] sm:$0xff] }
 0x248   :  { %v3009_v16 = vmul.f32 %v3005_v8, %v6550_v35  ;;  %v3008_v25 = vmul.f32 %v3002_v12, %v6575_v52  ;;  %v3423_v54 = vld [vmem:[%s7343_s7 + $0x1b8] sm:$0xff]  ;;  %v5836_v8 = vpack.c.bf16 %v3391_v6, %v3390_v55  ;;  %v3374_v12 = vld [vmem:[%s7343_s7 + $0x30] sm:$0xff] }
 0x249   :  { %3015 = vmatprep.subr.mxu0 %v3007_v26  ;;  %v3162_v23 = vpop.permute.xlu0 %3161  ;;  %v5866_v26 = vpack.c.bf16 %v3405_v50, %v3404_v41  ;;  %v3431_v41 = vld [vmem:[%s7343_s7 + $0x1f8] sm:$0xff] }
 0x24a   :  { %v3164_v19 = vpop.permute.xlu1 %3163  ;;  %3086 = vmatprep.subr.mxu1 %v3009_v16  ;;  %v3375_v16 = vld [vmem:[%s7343_s7 + $0x38] sm:$0xff]  ;;  %v5884_v50 = vpack.c.bf16 %v3431_v41, %v3430_v1  ;;  %v5477_v1 = vld [vmem:[%s7345_s8 + $0x50] sm:$0xff] }
 0x24b   :  { %5446 = vmatmul.mubr.msk.f32.vlgmr.msra.gmra.mrb[2].mxu0 %vm1868_vm10, %v5445_v20  ;;  %v3171_v29 = vsel %vm1640_vm9, %v3162_v23, %v3164_v19  ;;  %v3415_v55 = vld [vmem:[%s7343_s7 + $0x178] sm:$0xff] }
 0x24c   :  { %3016 = vmatpush1.msra.mxu0 %v3006_v24  ;;  %5447 = vmatmul.mubr.msk.f32.vlgmr.msra.gmra.mrb[4].mxu1 %vm1868_vm10, %v5445_v20  ;;  %v3173_v38 = vmul.f32 %v3171_v29, %v6582_v58  ;;  %v3369_v58 = vld [vmem:[%s7343_s7 + $0x8] sm:$0xff]  ;;  %v5868_v20 = vpack.c.bf16 %v3423_v54, %v3422_v4  ;;  %v3406_v24 = vld [vmem:[%s7343_s7 + $0x130] sm:$0xff]  ;;  %v3376_v29 = vld [vmem:[%s7343_s7 + $0x40] sm:$0xff] }
 0x24d   :  { %3087 = vmatpush1.msra.mxu1 %v3008_v25  ;;  %v3166_v28 = vpop.permute.xlu0 %3165  ;;  %3079 = vmatprep.mubr.f32.mxu0 %v6100_v2  ;;  %v5826_v22 = vpack.c.bf16 %v3369_v58, %v3368_v40  ;;  %v3426_v40 = vld [vmem:[%s7343_s7 + $0x1d0] sm:$0xff]  ;;  %v3338_v4 = vld [vmem:[%s7344_s5] sm:$0xf] }
 0x24e   :  { %v3170_v35 = vsel %vm1640_vm9, %v3164_v19, %v3166_v28  ;;  %v3168_v61 = vpop.permute.xlu1 %3167  ;;  %3150 = vmatprep.mubr.f32.mxu1 %v6100_v2  ;;  %v3407_v19 = vld [vmem:[%s7343_s7 + $0x138] sm:$0xff]  ;;  %v3343_v54 = vrot.slane %v3338_v4, %v6287_v11 }
 0x24f   :  { %v3174_v52 = vmul.f32 %v3170_v35, %v6572_v49  ;;  %v3172_v0 = vsel %vm1640_vm9, %v3168_v61, %v3162_v23  ;;  %v3169_v59 = vsel %vm1640_vm9, %v3166_v28, %v3168_v61  ;;  %v5448_v49 = vld [vmem:[%s7342_s3 + $0x38] sm:$0xff]  ;;  %v5838_v23 = vpack.c.bf16 %v3375_v16, %v3374_v12  ;;  %v3392_v28 = vld [vmem:[%s7343_s7 + $0xc0] sm:$0xff]  ;;  %v3393_v35 = vld [vmem:[%s7343_s7 + $0xc8] sm:$0xff] }
 0x250   :  { %v3176_v32 = vmul.f32 %v3172_v0, %v6589_v5  ;;  %v3175_v39 = vmul.f32 %v3169_v59, %v6607_v27  ;;  %v5856_v5 = vpack.c.bf16 %v3417_v17, %v3416_v34  ;;  %v3400_v27 = vld [vmem:[%s7343_s7 + $0x100] sm:$0xff]  ;;  %v5870_v25 = vpack.c.bf16 %v3407_v19, %v3406_v24  ;;  %v3394_v17 = vld [vmem:[%s7343_s7 + $0xd0] sm:$0xff] }
 0x251   :  { %3182 = vmatprep.subr.mxu0 %v3174_v52  ;;  %v5858_v21 = vpack.c.bf16 %v3401_v43, %v3400_v27  ;;  %v5840_v61 = vpack.c.bf16 %v3393_v35, %v3392_v28  ;;  %v3377_v52 = vld [vmem:[%s7343_s7 + $0x48] sm:$0xff]  ;;  %v3408_v59 = vld [vmem:[%s7343_s7 + $0x140] sm:$0xff]  ;;  %v3427_v27 = vld [vmem:[%s7343_s7 + $0x1d8] sm:$0xff]  ;;  %v3355_v24 = vrot.slane %v3338_v4, %v6294_v15 }
 0x252   :  { %3253 = vmatprep.subr.mxu1 %v3176_v32  ;;  %v5842_v0 = vpack.c.bf16 %v3377_v52, %v3376_v29  ;;  %v5872_v32 = vpack.c.bf16 %v3425_v30, %v3424_v13  ;;  %v3410_v43 = vld [vmem:[%s7343_s7 + $0x150] sm:$0xff]  ;;  %v5876_v7 = vpack.c.bf16 %v3427_v27, %v3426_v40  ;;  %v3583_v15 = vld [vmem:[%s7345_s8] sm:$0xff] }
 0x253   :  { %5449 = vmatmul.mubr.msk.f32.vlgmr.msra.gmra.mrb[2].mxu0 %vm1868_vm10, %v5448_v49  ;;  %v7060_v27 = vld [vmem:[%s7347_s13 + $0x1] ss:$0 sm:$0xff] }
 0x254   :  { %3183 = vmatpush1.msra.mxu0 %v3173_v38  ;;  %5450 = vmatmul.mubr.msk.f32.vlgmr.msra.gmra.mrb[4].mxu1 %vm1868_vm10, %v5448_v49  ;;  %v3409_v49 = vld [vmem:[%s7343_s7 + $0x148] sm:$0xff]  ;;  %v3395_v38 = vld [vmem:[%s7343_s7 + $0xd8] sm:$0xff] }
 0x255   :  { %3254 = vmatpush1.msra.mxu1 %v3175_v39  ;;  %3246 = vmatprep.mubr.f32.mxu0 %v6100_v2  ;;  %v5874_v34 = vpack.c.bf16 %v3409_v49, %v3408_v59  ;;  %v3378_v39 = vld [vmem:[%s7343_s7 + $0x50] sm:$0xff] }
 0x256   :  { %3317 = vmatprep.mubr.f32.mxu1 %v6100_v2  ;;  %5825 = vmatprep.subr.bf16.mxu0 %v5824_v9  ;;  %v3419_v2 = vld [vmem:[%s7343_s7 + $0x198] sm:$0xff]  ;;  %v5844_v9 = vpack.c.bf16 %v3395_v38, %v3394_v17 }
 0x257   :  { %5857 = vmatprep.subr.bf16.mxu1 %v5856_v5  ;;  %v5860_v48 = vpack.c.bf16 %v3419_v2, %v3418_v18  ;;  %v3379_v5 = vld [vmem:[%s7343_s7 + $0x58] sm:$0xff]  ;;  %v5878_v18 = vpack.c.bf16 %v3411_v3, %v3410_v43  ;;  %v3396_v2 = vld [vmem:[%s7343_s7 + $0xe0] sm:$0xff]  ;;  %v3584_v3 = vld [vmem:[%s7345_s8 + $0x8] sm:$0xff] }
 0x258   :  { %v5846_v58 = vpack.c.bf16 %v3379_v5, %v3378_v39  ;;  %v4405_v39 = vld [vmem:[%s7346_s9] sm:$0xff] }
 0x259   :  { %v7054_v5 = vld [vmem:[%s7347_s13] ss:$0 sm:$0xff] }
 0x25b   :  { %5452 = vmatmul.mubr.msk.f32.vlgmr.msra.gmra.mrb[2].mxu0 %vm1868_vm10, %v5451_v33 }
 0x25c   :  { %5453 = vmatmul.mubr.msk.f32.vlgmr.msra.gmra.mrb[4].mxu1 %vm1868_vm10, %v5451_v33  ;;  %5827 = vmatpush3.bf16.msra.mxu0 %v5826_v22  ;;  %v3397_v33 = vld [vmem:[%s7343_s7 + $0xe8] sm:$0xff]  ;;  %v3380_v22 = vld [vmem:[%s7343_s7 + $0x60] sm:$0xff] }
 0x25d   :  { %5859 = vmatpush3.bf16.msra.mxu1 %v5858_v21  ;;  %5829 = vmatprep.subr.bf16.mxu0 %v5828_v45  ;;  %v5848_v21 = vpack.c.bf16 %v3397_v33, %v3396_v2  ;;  %v3381_v45 = vld [vmem:[%s7343_s7 + $0x68] sm:$0xff]  ;;  %v7074_v2 = vld [vmem:[%s7347_s13 + $0x2] ss:$0 sm:$0xff] }
 0x25e   :  { %5861 = vmatprep.subr.bf16.mxu1 %v5860_v48  ;;  %v5850_v46 = vpack.c.bf16 %v3381_v45, %v3380_v22  ;;  %v5880_v48 = vpack.c.bf16 %v3429_v36, %v3428_v47  ;;  %v5455_v22 = vld [vmem:[%s7345_s8 + $0x48] sm:$0xff]  ;;  %v7088_v47 = vld [vmem:[%s7347_s13 + $0x3] ss:$0 sm:$0xff] }
 0x260   :  { %5831 = vmatpush3.bf16.msra.mxu0 %v5830_v56  ;;  %v3382_v56 = vld [vmem:[%s7343_s7 + $0x70] sm:$0xff] }
 0x261   :  { %5863 = vmatpush3.bf16.msra.mxu1 %v5862_v57  ;;  %5833 = vmatprep.subr.bf16.mxu0 %v5832_v62  ;;  %v3383_v57 = vld [vmem:[%s7343_s7 + $0x78] sm:$0xff]  ;;  %v5852_v62 = vpack.c.bf16 %v3399_v37, %v3398_v42  ;;  %v5472_v37 = vld [vmem:[%s7345_s8 + $0x30] sm:$0xff] }
 0x262   :  { %5865 = vmatprep.subr.bf16.mxu1 %v5864_v44  ;;  %v5854_v63 = vpack.c.bf16 %v3383_v57, %v3382_v56  ;;  %v3414_v44 = vld [vmem:[%s7343_s7 + $0x170] sm:$0xff]  ;;  %v7116_v57 = vld [vmem:[%s7347_s13 + $0x6] ss:$0 sm:$0xff] }
 0x263   :  { %v5886_v6 = vpack.c.bf16 %v3415_v55, %v3414_v44  ;;  %v7130_v44 = vld [vmem:[%s7347_s13 + $0x7] ss:$0 sm:$0xff]  ;;  %v5478_v55 = vld [vmem:[%s7345_s8 + $0x58] sm:$0xff] }
 0x264   :  { %5835 = vmatpush3.bf16.msra.mxu0 %v5834_v60  ;;  %v3332_v60 = vpop.permute.xlu0 %3331 }
 0x265   :  { %5867 = vmatpush3.bf16.msra.mxu1 %v5866_v26  ;;  %5837 = vmatprep.subr.bf16.mxu0 %v5836_v8  ;;  %v3347_v8 = vrot.slane %v3338_v4, %v6285_v10 }
 0x266   :  { %5869 = vmatprep.subr.bf16.mxu1 %v5868_v20 }
 0x268   :  { %5839 = vmatpush3.bf16.msra.mxu0 %v5838_v23  ;;  %v3351_v23 = vrot.slane %v3338_v4, %v6292_v14 }
 0x269   :  { %5871 = vmatpush3.bf16.msra.mxu1 %v5870_v25  ;;  %5841 = vmatprep.subr.bf16.mxu0 %v5840_v61 }
 0x26a   :  { %5873 = vmatprep.subr.bf16.mxu1 %v5872_v32 }
 0x26c   :  { %5843 = vmatpush3.bf16.msra.mxu0 %v5842_v0 }
 0x26d   :  { %5875 = vmatpush3.bf16.msra.mxu1 %v5874_v34  ;;  %5845 = vmatprep.subr.bf16.mxu0 %v5844_v9  ;;  %v4406_v9 = vld [vmem:[%s7346_s9 + $0x8] sm:$0xff] }
 0x26e   :  { %5877 = vmatprep.subr.bf16.mxu1 %v5876_v7  ;;  %v5454_v7 = vld [vmem:[%s7345_s8 + $0x40] sm:$0xff] }
 0x270   :  { %5847 = vmatpush3.bf16.msra.mxu0 %v5846_v58 }
 0x271   :  { %5879 = vmatpush3.bf16.msra.mxu1 %v5878_v18  ;;  %5849 = vmatprep.subr.bf16.mxu0 %v5848_v21  ;;  %v5462_v21 = vld [vmem:[%s7345_s8 + $0x10] sm:$0xff] }
 0x272   :  { %5881 = vmatprep.subr.bf16.mxu1 %v5880_v48  ;;  %v5467_v48 = vld [vmem:[%s7345_s8 + $0x20] sm:$0xff] }
 0x274   :  { %5851 = vmatpush3.bf16.msra.mxu0 %v5850_v46  ;;  %v5463_v46 = vld [vmem:[%s7345_s8 + $0x18] sm:$0xff] }
 0x275   :  { %5883 = vmatpush3.bf16.msra.mxu1 %v5882_v53  ;;  %5853 = vmatprep.subr.bf16.mxu0 %v5852_v62  ;;  %v5468_v53 = vld [vmem:[%s7345_s8 + $0x28] sm:$0xff] }
 0x276   :  { %5885 = vmatprep.subr.bf16.mxu1 %v5884_v50 }
 0x278   :  { %5855 = vmatpush3.bf16.msra.mxu0 %v5854_v63  ;;  %v5473_v63 = vld [vmem:[%s7345_s8 + $0x38] sm:$0xff] }
 0x279   :  { %5887 = vmatpush3.bf16.msra.mxu1 %v5886_v6  ;;  %v5482_v6 = vld [vmem:[%s7345_s8 + $0x60] sm:$0xff] }
 0x32e   :  { %v3248_v26 = vpop.f32.mrb[2].mxu0 }
 0x32f   :  { %v3334_v12 = vadd.f32 %v3332_v60, %v3248_v26  ;;  %v3250_v16 = vpop.f32.mrb[3].mxu0  ;;  %v3319_v20 = vpop.f32.mrb[4].mxu1  ;;  %v5483_v26 = vld [vmem:[%s7345_s8 + $0x68] sm:$0xff] }
 0x330   :  { %v3335_v19 = vadd.f32 %v3332_v60, %v3250_v16  ;;  %v3336_v25 = vadd.f32 %v3332_v60, %v3319_v20  ;;  %v3321_v28 = vpop.f32.mrb[5].mxu1  ;;  %v5488_v16 = vld [vmem:[%s7345_s8 + $0x78] sm:$0xff]  ;;  %v5492_v20 = vld [vmem:[%s7345_s8 + $0x80] sm:$0xff] }
 0x331   :  { %v3360_v35 = vmul.f32 %v3343_v54, %v3334_v12  ;;  %v3337_v61 = vadd.f32 %v3332_v60, %v3321_v28  ;;  %v7144_v54 = vld [vmem:[%s7347_s13 + $0x8] ss:$0 sm:$0xff] }
 0x332   :  { %v3361_v29 = vmul.f32 %v3347_v8, %v3335_v19  ;;  %v3362_v52 = vmul.f32 %v3351_v23, %v3336_v25  ;;  %v5487_v8 = vld [vmem:[%s7345_s8 + $0x70] sm:$0xff]  ;;  %v5493_v23 = vld [vmem:[%s7345_s8 + $0x88] sm:$0xff] }
 0x333   :  { %v3363_v0 = vmul.f32 %v3355_v24, %v3337_v61 }
 0x334   :  { %6080 = vtanh.f32 %v3361_v29  ;;  %v4430_v29 = vld [vmem:[%s7348_s10] sm:$0xff] }
 0x335   :  { %6082 = vtanh.f32 %v3360_v35 }
 0x336   :  { %6084 = vtanh.f32 %v3363_v0 }
 0x337   :  { %6086 = vtanh.f32 %v3362_v52 }
 0x33e   :  { %v6081_v10 = vpop.eup %6080 }
 0x33f   :  { %v6083_v11 = vpop.eup %6082  ;;  %3496 = vmatprep.mubr.f32.mxu0 %v6081_v10 }
 0x340   :  { %v6085_v13 = vpop.eup %6084  ;;  %3497 = vmatmul.mubr.f32.vlgmr.msra.gmra.mrb[4].mxu0 %v6083_v11  ;;  %v5240_v11 = vld [vmem:[%s7349_s11 + $0x8] sm:$0xff] }
 0x341   :  { %v6087_v14 = vpop.eup %6086  ;;  %3566 = vmatprep.mubr.f32.mxu1 %v6085_v13  ;;  %5683 = vmatprep.mubr.msk.f32.mxu0 %vm1868_vm10, %v3583_v15  ;;  %v5239_v13 = vld [vmem:[%s7349_s11] sm:$0xff]  ;;  %v5260_v15 = vld [vmem:[%s7350_s14 + $0x8] sm:$0xff] }
 0x342   :  { %3567 = vmatmul.mubr.f32.vlgmr.msra.gmra.mrb[6].mxu1 %v6087_v14  ;;  %v5259_v14 = vld [vmem:[%s7350_s14] sm:$0xff] }
 0x343   :  { %5730 = vmatprep.mubr.msk.f32.mxu1 %vm4432_vm11, %v4430_v29  ;;  %v5515_v29 = vld [vmem:[%s7348_s10 + $0x58] sm:$0xff] }
 0x413   :  { %v5562_v30 = vpop.f32.mrb[4].mxu0 }
 0x414   :  { %v5563_v59 = vpop.f32.mrb[5].mxu0 }
 0x415   :  { %v5564_v32 = vadd.f32 %v5563_v59, %v5562_v30  ;;  %v5597_v49 = vpop.f32.mrb[6].mxu1  ;;  %v5261_v30 = vld [vmem:[%s7350_s14 + $0x10] sm:$0xff]  ;;  %v5924_v59 = vpack.c.bf16 %v5260_v15, %v5259_v14  ;;  %v5519_v14 = vld [vmem:[%s7348_s10 + $0x68] sm:$0xff] }
 0x416   :  { %v5598_v34 = vpop.f32.mrb[7].mxu1  ;;  %v5522_v15 = vld [vmem:[%s7348_s10 + $0x70] sm:$0xff] }
 0x417   :  { %v5599_v17 = vadd.f32 %v5598_v34, %v5597_v49  ;;  %v5263_v34 = vld [vmem:[%s7350_s14 + $0x20] sm:$0xff] }
 0x419   :  { %v3569_v38 = vadd.f32 %v5599_v17, %v5564_v32  ;;  %v5262_v32 = vld [vmem:[%s7350_s14 + $0x18] sm:$0xff]  ;;  %v5264_v17 = vld [vmem:[%s7350_s14 + $0x28] sm:$0xff] }
 0x41a   :  { %v5928_v49 = vpack.c.bf16 %v5262_v32, %v5261_v30  ;;  %v5527_v32 = vld [vmem:[%s7348_s10 + $0x88] sm:$0xff] }
 0x41b   :  { %3747 = vrot.lane.b32.xlu0 %v3569_v38, %s6110_s1  ;;  %3575 = vrot.lane.b32.xlu1 %v3569_v38, %s6111_s22 }
 0x41f   :  { %3935 = vrot.lane.b32.xlu0 %v3569_v38, %s6104_s24  ;;  %3841 = vrot.lane.b32.xlu1 %v3569_v38, %s6112_s4 }
 0x423   :  { %4123 = vrot.lane.b32.xlu0 %v3569_v38, %s6113_s0  ;;  %4029 = vrot.lane.b32.xlu1 %v3569_v38, %s6105_s25 }
 0x427   :  { %4311 = vrot.lane.b32.xlu0 %v3569_v38, %s6114_s23  ;;  %4217 = vrot.lane.b32.xlu1 %v3569_v38, %s6115_s26 }
 0x42b   :  { %4414 = vperm.xlu0 %6068, %v4406_v9   ;;  %4409 = vperm.xlu1 %6069, %v4405_v39   ;;  %v5265_v9 = vld [vmem:[%s7350_s14 + $0x30] sm:$0xff]  ;;  %v5266_v39 = vld [vmem:[%s7350_s14 + $0x38] sm:$0xff] }
 0x48d   :  { %v3576_v40 = vpop.permute.xlu1 %3575  ;;  %v3748_v43 = vpop.permute.xlu0 %3747 }
 0x48e   :  { %v3582_v58 = vmul.f32 %v7054_v5, %v3576_v40  ;;  %v3754_v18 = vmul.f32 %v7060_v27, %v3748_v43  ;;  %v5936_v40 = vpack.c.bf16 %v5266_v39, %v5265_v9  ;;  %v5270_v9 = vld [vmem:[%s7350_s14 + $0x58] sm:$0xff] }
 0x490   :  { %5681 = vmatprep.subr.mxu0 %v3582_v58 }
 0x491   :  { %5682 = vmatpush3.msra.mxu0 %v3582_v58  ;;  %v3842_v33 = vpop.permute.xlu1 %3841  ;;  %v3936_v36 = vpop.permute.xlu0 %3935 }
 0x492   :  { %5684 = vmatmul.mubr.msk.f32.vlgmr.msra.gmra.mrb[6].mxu0 %vm1868_vm10, %v3584_v3  ;;  %5686 = vmatprep.subr.mxu0 %v3569_v38  ;;  %v3848_v45 = vmul.f32 %v7074_v2, %v3842_v33  ;;  %v3942_v31 = vmul.f32 %v7088_v47, %v3936_v36  ;;  %v4431_v36 = vld [vmem:[%s7348_s10 + $0x8] sm:$0xff] }
 0x493   :  { %5687 = vmatpush3.msra.mxu0 %v3569_v38  ;;  %5688 = vmatprep.mubr.msk.f32.mxu0 %vm1868_vm10, %v5454_v7  ;;  %v5932_v38 = vpack.c.bf16 %v5264_v17, %v5263_v34  ;;  %v5268_v34 = vld [vmem:[%s7350_s14 + $0x48] sm:$0xff] }
 0x494   :  { %5691 = vmatprep.subr.mxu0 %v3754_v18 }
 0x495   :  { %v4030_v42 = vpop.permute.xlu1 %4029  ;;  %v4124_v62 = vpop.permute.xlu0 %4123 }
 0x496   :  { %v4036_v56 = vmul.f32 %v7102_v51, %v4030_v42  ;;  %v4130_v41 = vmul.f32 %v7116_v57, %v4124_v62 }
 0x499   :  { %v4218_v50 = vpop.permute.xlu1 %4217  ;;  %v4312_v60 = vpop.permute.xlu0 %4311 }
 0x49a   :  { %5689 = vmatmul.mubr.msk.f32.vlgmr.msra.gmra.mrb[6].mxu0 %vm1868_vm10, %v5455_v22  ;;  %v4224_v4 = vmul.f32 %v7130_v44, %v4218_v50  ;;  %v4318_v12 = vmul.f32 %v7144_v54, %v4312_v60  ;;  %v5506_v50 = vld [vmem:[%s7348_s10 + $0x20] sm:$0xff] }
 0x49b   :  { %5692 = vmatpush3.msra.mxu0 %v3754_v18  ;;  %5693 = vmatprep.mubr.msk.f32.mxu0 %vm1868_vm10, %v5462_v21 }
 0x49c   :  { %5696 = vmatprep.subr.mxu0 %v3848_v45 }
 0x4a2   :  { %5694 = vmatmul.mubr.msk.f32.vlgmr.msra.gmra.mrb[6].mxu0 %vm1868_vm10, %v5463_v46  ;;  %v5496_v46 = vld [vmem:[%s7348_s10 + $0x40] sm:$0xff] }
 0x4a3   :  { %5697 = vmatpush3.msra.mxu0 %v3848_v45  ;;  %5698 = vmatprep.mubr.msk.f32.mxu0 %vm1868_vm10, %v5467_v48 }
 0x4a4   :  { %5701 = vmatprep.subr.mxu0 %v3942_v31 }
 0x4aa   :  { %5699 = vmatmul.mubr.msk.f32.vlgmr.msra.gmra.mrb[6].mxu0 %vm1868_vm10, %v5468_v53  ;;  %v4410_v24 = vpop.permute.xlu1 %4409  ;;  %v4415_v19 = vpop.permute.xlu0 %4414  ;;  %v5497_v53 = vld [vmem:[%s7348_s10 + $0x48] sm:$0xff] }
 0x4ab   :  { %5702 = vmatpush3.msra.mxu0 %v3942_v31  ;;  %5703 = vmatprep.mubr.msk.f32.mxu0 %vm1868_vm10, %v5472_v37  ;;  %v5502_v37 = vld [vmem:[%s7348_s10 + $0x10] sm:$0xff] }
 0x4ac   :  { %5706 = vmatprep.subr.mxu0 %v4036_v56 }
 0x4b2   :  { %5704 = vmatmul.mubr.msk.f32.vlgmr.msra.gmra.mrb[6].mxu0 %vm1868_vm10, %v5473_v63 }
 0x4b3   :  { %5707 = vmatpush3.msra.mxu0 %v4036_v56  ;;  %5708 = vmatprep.mubr.msk.f32.mxu0 %vm1868_vm10, %v5477_v1 }
 0x4b4   :  { %5711 = vmatprep.subr.mxu0 %v4130_v41 }
 0x4ba   :  { %5709 = vmatmul.mubr.msk.f32.vlgmr.msra.gmra.mrb[6].mxu0 %vm1868_vm10, %v5478_v55 }
 0x4bb   :  { %5712 = vmatpush3.msra.mxu0 %v4130_v41  ;;  %5713 = vmatprep.mubr.msk.f32.mxu0 %vm1868_vm10, %v5482_v6  ;;  %v5503_v41 = vld [vmem:[%s7348_s10 + $0x18] sm:$0xff] }
 0x4bc   :  { %5716 = vmatprep.subr.mxu0 %v4224_v4 }
 0x4c2   :  { %5714 = vmatmul.mubr.msk.f32.vlgmr.msra.gmra.mrb[6].mxu0 %vm1868_vm10, %v5483_v26  ;;  %v5507_v26 = vld [vmem:[%s7348_s10 + $0x28] sm:$0xff] }
 0x4c3   :  { %5717 = vmatpush3.msra.mxu0 %v4224_v4  ;;  %5718 = vmatprep.mubr.msk.f32.mxu0 %vm1868_vm10, %v5487_v8  ;;  %v5510_v8 = vld [vmem:[%s7348_s10 + $0x30] sm:$0xff] }
 0x4c4   :  { %5721 = vmatprep.subr.mxu0 %v4318_v12 }
 0x4ca   :  { %5719 = vmatmul.mubr.msk.f32.vlgmr.msra.gmra.mrb[6].mxu0 %vm1868_vm10, %v5488_v16 }
 0x4cb   :  { %5722 = vmatpush3.msra.mxu0 %v4318_v12  ;;  %5723 = vmatprep.mubr.msk.f32.mxu0 %vm1868_vm10, %v5492_v20 }
 0x4cc   :  { %5925 = vmatprep.subr.bf16.mxu0 %v5924_v59 }
 0x4d2   :  { %5724 = vmatmul.mubr.msk.f32.vlgmr.msra.gmra.mrb[6].mxu0 %vm1868_vm10, %v5493_v23 }
 0x4d3   :  { %5927 = vmatpush3.bf16.msra.mxu0 %v5924_v59  ;;  %v5523_v59 = vld [vmem:[%s7348_s10 + $0x78] sm:$0xff] }
 0x4d4   :  { %5929 = vmatprep.subr.bf16.mxu0 %v5928_v49 }
 0x4d7   :  { %5931 = vmatpush3.bf16.msra.mxu0 %v5928_v49  ;;  %v5267_v49 = vld [vmem:[%s7350_s14 + $0x40] sm:$0xff] }
 0x4d8   :  { %5933 = vmatprep.subr.bf16.mxu0 %v5932_v38  ;;  %v5940_v17 = vpack.c.bf16 %v5268_v34, %v5267_v49 }
 0x4db   :  { %5935 = vmatpush3.bf16.msra.mxu0 %v5932_v38  ;;  %v5269_v38 = vld [vmem:[%s7350_s14 + $0x50] sm:$0xff] }
 0x4dc   :  { %5937 = vmatprep.subr.bf16.mxu0 %v5936_v40  ;;  %v5944_v39 = vpack.c.bf16 %v5270_v9, %v5269_v38 }
 0x4df   :  { %5939 = vmatpush3.bf16.msra.mxu0 %v5936_v40  ;;  %v5271_v40 = vld [vmem:[%s7350_s14 + $0x60] sm:$0xff] }
 0x4e0   :  { %5941 = vmatprep.subr.bf16.mxu0 %v5940_v17 }
 0x4e3   :  { %5943 = vmatpush3.bf16.msra.mxu0 %v5940_v17 }
 0x4e4   :  { %5945 = vmatprep.subr.bf16.mxu0 %v5944_v39 }
 0x4e7   :  { %5947 = vmatpush3.bf16.msra.mxu0 %v5944_v39 }
 0x5a5   :  { %v5725_v25 = vpop.f32.mrb[6].mxu0 }
 0x5a6   :  { %v4418_v28 = vadd.f32 %v5725_v25, %v4415_v19  ;;  %v4394_v35 = vpop.f32.mrb[7].mxu0  ;;  %v5514_v19 = vld [vmem:[%s7348_s10 + $0x50] sm:$0xff] }
 0x5a7   :  { %v4417_v61 = vadd.f32 %v4410_v24, %v4394_v35  ;;  %v5511_v24 = vld [vmem:[%s7348_s10 + $0x38] sm:$0xff] }
 0x5a8   :  { %6088 = vtanh.f32 %v4418_v28 }
 0x5a9   :  { %6090 = vtanh.f32 %v4417_v61 }
 0x5b2   :  { %v6089_v52 = vpop.eup %6088 }
 0x5b3   :  { %v6091_v0 = vpop.eup %6090  ;;  %4426 = vrot.lane.b32.xlu0 %v6089_v52, %s6111_s22 }
 0x5b4   :  { %4424 = vrot.lane.b32.xlu1 %v6091_v0, %s6111_s22  ;;  %v5892_v10 = vpack.c.bf16 %v6089_v52, %v6091_v0 }
 0x5b7   :  { %4597 = vrot.lane.b32.xlu0 %v6089_v52, %s6110_s1 }
 0x5b8   :  { %4595 = vrot.lane.b32.xlu1 %v6091_v0, %s6110_s1 }
 0x5bb   :  { %4689 = vrot.lane.b32.xlu0 %v6089_v52, %s6112_s4 }
 0x5bc   :  { %4687 = vrot.lane.b32.xlu1 %v6091_v0, %s6112_s4 }
 0x5bf   :  { %4781 = vrot.lane.b32.xlu0 %v6089_v52, %s6104_s24 }
 0x5c0   :  { %4779 = vrot.lane.b32.xlu1 %v6091_v0, %s6104_s24 }
 0x5c3   :  { %4873 = vrot.lane.b32.xlu0 %v6089_v52, %s6105_s25 }
 0x5c4   :  { %4871 = vrot.lane.b32.xlu1 %v6091_v0, %s6105_s25 }
 0x5c7   :  { %4965 = vrot.lane.b32.xlu0 %v6089_v52, %s6113_s0 }
 0x5c8   :  { %4963 = vrot.lane.b32.xlu1 %v6091_v0, %s6113_s0 }
 0x5cb   :  { %5057 = vrot.lane.b32.xlu0 %v6089_v52, %s6115_s26 }
 0x5cc   :  { %5055 = vrot.lane.b32.xlu1 %v6091_v0, %s6115_s26 }
 0x5cf   :  { %5149 = vrot.lane.b32.xlu0 %v6089_v52, %s6114_s23  ;;  %v5518_v52 = vld [vmem:[%s7348_s10 + $0x60] sm:$0xff] }
 0x5d0   :  { %5147 = vrot.lane.b32.xlu1 %v6091_v0, %s6114_s23 }
 0x5d3   :  { %5248 = vperm.xlu0 %6068, %v5240_v11  }
 0x5d4   :  { %5243 = vperm.xlu1 %6069, %v5239_v13  }
 0x625   :  { %v4427_v58 = vpop.permute.xlu0 %4426 }
 0x626   :  { %v4429_v43 = vmul.f32 %v7054_v5, %v4427_v58  ;;  %v4425_v3 = vpop.permute.xlu1 %4424  ;;  %v5272_v58 = vld [vmem:[%s7350_s14 + $0x68] sm:$0xff] }
 0x627   :  { %v4428_v7 = vmul.f32 %v7054_v5, %v4425_v3  ;;  %v5948_v3 = vpack.c.bf16 %v5272_v58, %v5271_v40 }
 0x629   :  { %v5888_v18 = vpack.c.bf16 %v4429_v43, %v4428_v7  ;;  %v4598_v33 = vpop.permute.xlu0 %4597  ;;  %v5273_v43 = vld [vmem:[%s7350_s14 + $0x70] sm:$0xff]  ;;  %v5274_v7 = vld [vmem:[%s7350_s14 + $0x78] sm:$0xff]  ;;  %5949 = vmatprep.subr.bf16.mxu0 %v5948_v3 }
 0x62a   :  { %v4596_v22 = vpop.permute.xlu1 %4595  ;;  %v4600_v21 = vmul.f32 %v7060_v27, %v4598_v33  ;;  %5951 = vmatpush3.bf16.msra.mxu0 %v5948_v3 }
 0x62b   :  { %v4599_v45 = vmul.f32 %v7060_v27, %v4596_v22  ;;  %5889 = vmatprep.subr.bf16.mxu1 %v5888_v18 }
 0x62c   :  { %5891 = vmatpush3.bf16.msra.mxu1 %v5888_v18  ;;  %v5952_v18 = vpack.c.bf16 %v5274_v7, %v5273_v43 }
 0x62d   :  { %5893 = vmatprep.subr.bf16.mxu1 %v5892_v10  ;;  %v5896_v48 = vpack.c.bf16 %v4600_v21, %v4599_v45  ;;  %v4690_v5 = vpop.permute.xlu0 %4689  ;;  %v5254_v21 = vld [vmem:[%s7351_s12 + $0x8] sm:$0xff] }
 0x62e   :  { %v4688_v31 = vpop.permute.xlu1 %4687  ;;  %v4692_v27 = vmul.f32 %v7074_v2, %v4690_v5  ;;  %5953 = vmatprep.subr.bf16.mxu0 %v5952_v18 }
 0x62f   :  { %5731 = vmatmul.mubr.msk.f32.vlgmr.msra.gmra.mrb[8].mxu1 %vm4432_vm11, %v4431_v36  ;;  %v4691_v42 = vmul.f32 %v7074_v2, %v4688_v31  ;;  %5955 = vmatpush3.bf16.msra.mxu0 %v5952_v18 }
 0x630   :  { %5895 = vmatpush3.bf16.msra.mxu1 %v5892_v10  ;;  %5737 = vmatprep.mubr.msk.f32.mxu1 %vm4432_vm11, %v5496_v46 }
 0x631   :  { %5897 = vmatprep.subr.bf16.mxu1 %v5896_v48  ;;  %v5900_v56 = vpack.c.bf16 %v4692_v27, %v4691_v42  ;;  %v4782_v62 = vpop.permute.xlu0 %4781 }
 0x632   :  { %v4780_v63 = vpop.permute.xlu1 %4779  ;;  %v4784_v1 = vmul.f32 %v7088_v47, %v4782_v62 }
 0x633   :  { %v4783_v2 = vmul.f32 %v7088_v47, %v4780_v63 }
 0x635   :  { %v5904_v55 = vpack.c.bf16 %v4784_v1, %v4783_v2  ;;  %v4874_v6 = vpop.permute.xlu0 %4873 }
 0x636   :  { %v4872_v4 = vpop.permute.xlu1 %4871  ;;  %v4876_v60 = vmul.f32 %v7102_v51, %v4874_v6 }
 0x637   :  { %5738 = vmatmul.mubr.msk.f32.vlgmr.msra.gmra.mrb[8].mxu1 %vm4432_vm11, %v5497_v53  ;;  %v4875_v47 = vmul.f32 %v7102_v51, %v4872_v4 }
 0x638   :  { %5899 = vmatpush3.bf16.msra.mxu1 %v5896_v48  ;;  %5744 = vmatprep.mubr.msk.f32.mxu1 %vm4432_vm11, %v5502_v37  ;;  %v5253_v48 = vld [vmem:[%s7351_s12] sm:$0xff] }
 0x639   :  { %5901 = vmatprep.subr.bf16.mxu1 %v5900_v56  ;;  %v5908_v12 = vpack.c.bf16 %v4876_v60, %v4875_v47  ;;  %v4966_v16 = vpop.permute.xlu0 %4965 }
 0x63a   :  { %v4964_v20 = vpop.permute.xlu1 %4963  ;;  %v4968_v23 = vmul.f32 %v7116_v57, %v4966_v16 }
 0x63b   :  { %v4967_v51 = vmul.f32 %v7116_v57, %v4964_v20 }
 0x63d   :  { %v5912_v25 = vpack.c.bf16 %v4968_v23, %v4967_v51  ;;  %v5058_v28 = vpop.permute.xlu0 %5057 }
 0x63e   :  { %v5056_v35 = vpop.permute.xlu1 %5055  ;;  %v5060_v61 = vmul.f32 %v7130_v44, %v5058_v28 }
 0x63f   :  { %5745 = vmatmul.mubr.msk.f32.vlgmr.msra.gmra.mrb[8].mxu1 %vm4432_vm11, %v5503_v41  ;;  %v5059_v57 = vmul.f32 %v7130_v44, %v5056_v35 }
 0x640   :  { %5903 = vmatpush3.bf16.msra.mxu1 %v5900_v56  ;;  %5751 = vmatprep.mubr.msk.f32.mxu1 %vm4432_vm11, %v5506_v50 }
 0x641   :  { %5905 = vmatprep.subr.bf16.mxu1 %v5904_v55  ;;  %v5916_v0 = vpack.c.bf16 %v5060_v61, %v5059_v57  ;;  %v5150_v10 = vpop.permute.xlu0 %5149 }
 0x642   :  { %v5148_v11 = vpop.permute.xlu1 %5147  ;;  %v5152_v13 = vmul.f32 %v7144_v54, %v5150_v10 }
 0x643   :  { %v5151_v44 = vmul.f32 %v7144_v54, %v5148_v11  ;;  %v5526_v54 = vld [vmem:[%s7348_s10 + $0x80] sm:$0xff] }
 0x645   :  { %v5920_v30 = vpack.c.bf16 %v5152_v13, %v5151_v44 }
 0x647   :  { %5752 = vmatmul.mubr.msk.f32.vlgmr.msra.gmra.mrb[8].mxu1 %vm4432_vm11, %v5507_v26 }
 0x648   :  { %5907 = vmatpush3.bf16.msra.mxu1 %v5904_v55  ;;  %5758 = vmatprep.mubr.msk.f32.mxu1 %vm4432_vm11, %v5510_v8 }
 0x649   :  { %5909 = vmatprep.subr.bf16.mxu1 %v5908_v12 }
 0x64f   :  { %5759 = vmatmul.mubr.msk.f32.vlgmr.msra.gmra.mrb[8].mxu1 %vm4432_vm11, %v5511_v24 }
 0x650   :  { %5911 = vmatpush3.bf16.msra.mxu1 %v5908_v12  ;;  %5765 = vmatprep.mubr.msk.f32.mxu1 %vm4432_vm11, %v5514_v19 }
 0x651   :  { %5913 = vmatprep.subr.bf16.mxu1 %v5912_v25 }
 0x652   :  { %v5249_v33 = vpop.permute.xlu0 %5248 }
 0x653   :  { %v5244_v45 = vpop.permute.xlu1 %5243 }
 0x657   :  { %5766 = vmatmul.mubr.msk.f32.vlgmr.msra.gmra.mrb[8].mxu1 %vm4432_vm11, %v5515_v29 }
 0x658   :  { %5915 = vmatpush3.bf16.msra.mxu1 %v5912_v25  ;;  %5772 = vmatprep.mubr.msk.f32.mxu1 %vm4432_vm11, %v5518_v52 }
 0x659   :  { %5917 = vmatprep.subr.bf16.mxu1 %v5916_v0 }
 0x65f   :  { %5773 = vmatmul.mubr.msk.f32.vlgmr.msra.gmra.mrb[8].mxu1 %vm4432_vm11, %v5519_v14 }
 0x660   :  { %5919 = vmatpush3.bf16.msra.mxu1 %v5916_v0  ;;  %5779 = vmatprep.mubr.msk.f32.mxu1 %vm4432_vm11, %v5522_v15 }
 0x661   :  { %5921 = vmatprep.subr.bf16.mxu1 %v5920_v30 }
 0x667   :  { %5780 = vmatmul.mubr.msk.f32.vlgmr.msra.gmra.mrb[8].mxu1 %vm4432_vm11, %v5523_v59 }
 0x668   :  { %5923 = vmatpush3.bf16.msra.mxu1 %v5920_v30  ;;  %5786 = vmatprep.mubr.msk.f32.mxu1 %vm4432_vm11, %v5526_v54 }
 0x66f   :  { %5787 = vmatmul.mubr.msk.f32.vlgmr.msra.gmra.mrb[8].mxu1 %vm4432_vm11, %v5527_v32 }
 0x742   :  { %v5788_v22 = vpop.f32.mrb[8].mxu1 }
 0x743   :  { %v5252_v36 = vadd.f32 %v5788_v22, %v5249_v33  ;;  %v5228_v46 = vpop.f32.mrb[9].mxu1 }
 0x744   :  { %v5251_v5 = vadd.f32 %v5244_v45, %v5228_v46 }
 0x745   :  { %v5256_v31 = vmul.f32 %v5254_v21, %v5252_v36 }
 0x746   :  { %v5255_v27 = vmul.f32 %v5253_v48, %v5251_v5 }
 0x748   :  { %6092 = vtanh.f32 %v5255_v27 }
 0x749   :  { %6094 = vtanh.f32 %v5256_v31 }
 0x752   :  { %v6093_v42 = vpop.eup %6092 }
 0x753   :  { %v6095_v53 = vpop.eup %6094  ;;  %5821 = vmatprep.mubr.f32.mxu0 %v6093_v42 }
 0x754   :  { %5822 = vmatmul.mubr.f32.vlgmr.msra.gmra.mrb[8].mxu0 %v6095_v53 }
 0x827   :  { %v5823_v37 = vpop.f32.mrb[8].mxu0 }
 0x828   :  { %6096 = vtanh.f32 %v5823_v37  ;;  %v5341_v56 = vpop.f32.mrb[9].mxu0 }
 0x829   :  { %6098 = vtanh.f32 %v5341_v56 }
 0x832   :  { %v6097_v62 = vpop.eup %6096 }
 0x833   :  { %v6099_v63 = vpop.eup %6098  ;;  %5354 = vst.msk [vmem:[%s7352_s15 + $0x8] sm:$0xff] %vm5352_vm12, %v6097_v62 }
 0x834   :  { %5353 = vst.msk [vmem:[%s7352_s15] sm:$0xff] %vm5352_vm12, %v6099_v63 }

</bundles_post_ra>
